<compile_context>
chip_gen: v7x
topology: tpu7x:2x2x1
jax: 0.10.0
libtpu: 0.0.40
codegen_flags: <defaults>
</compile_context>

<pallas_src>
import jax
import jax.numpy as jnp
import numpy as np
from jax import lax
from jax.experimental import pallas as pl
from jax.experimental.pallas import tpu as pltpu

# ---------------- configuration (small, consistent with the module) -----------
NUM_ITEMS  = 50
ITEM_EMBED = 8     # item_embed_size
RNN_DIM    = 32    # rnn_dim (H)
HIDDEN_DIM = 16    # enc_dims (Dh)
LATENT_DIM = 16    # latent_dim (L)
BATCH      = 2
SEQ        = 8
GROUPS     = 4     # independent forward passes per kernel call

N  = BATCH * SEQ
H  = RNN_DIM
GL = 128                    # lanes per GRU gate block (128-lane aligned)
GW = 3 * GL                 # 384 = slab width
NI_PAD = 56                 # NUM_ITEMS padded to a multiple of 8

assert HIDDEN_DIM == LATENT_DIM          # required by Decoder in the source
assert BATCH * SEQ == LATENT_DIM         # required by sample_latent broadcast

# ---- slab row offsets (all multiples of 8) ----
R_PROJ  = 0                              # (NI_PAD, GW)  item_embed @ W_ih.T
R_WHH   = R_PROJ + NI_PAD                # (GL, GW)      W_hh.T gate-aligned
R_WENC  = R_WHH + GL                     # (GL, GW)      enc_w.T   (cols 0:Dh)
R_WLIN  = R_WENC + GL                    # (Dh, GW)      lin1_w.T  (cols 0:2L)
R_WD1   = R_WLIN + HIDDEN_DIM            # (L,  GW)      dec1_w.T  (cols 0:Dh)
R_WD2   = R_WD1 + LATENT_DIM             # (Dh, GW)      dec2_w.T  (cols 0:Dh)
R_BIAS  = R_WD2 + HIDDEN_DIM             # (8,  GW)      bias rows
R_TOTAL = R_BIAS + 8                     # 368


# ------------------------------- Pallas kernel --------------------------------
def svae_kernel(ids_ref, std_ref, slab_ref, out_ref, hs_ref):
    # ids_ref : (1, N, 1)  int32 item ids (b-major flattened) for this group
    # std_ref : (1, 1, GL) f32, std-normal noise in lanes [0:N)
    # slab_ref: (R_TOTAL, GW) f32 packed parameter slab (see offsets above)
    # out_ref : (1, N, GL) f32, decoder output in lanes [0:Dh)
    # hs_ref  : (N, GL)    VMEM scratch, GRU hidden states in b-major row order
    B, S, Dh, L = BATCH, SEQ, HIDDEN_DIM, LATENT_DIM

    # ---- bias rows (single sublane-aligned load, static lane slices) ----
    bias  = slab_ref[R_BIAS:R_BIAS + 8, :]                    # (8, GW)
    b_gi  = bias[0:1, :]                                      # gate-aligned
    bhn   = jnp.broadcast_to(bias[1:2, 0:GL], (B, GL))        # hoisted (B,128)
    b_enc = bias[2:3, 0:Dh]
    b_lin = bias[3:4, 0:2 * L]
    b_d1  = bias[4:5, 0:Dh]
    b_d2  = bias[5:6, 0:GL]                                   # padded (1,128)

    # ---- fused embedding gather + input projection: onehot @ proj (MXU) ----
    ids    = ids_ref[0]                                            # (N, 1) i32
    iota   = lax.broadcasted_iota(jnp.int32, (N, NI_PAD), 1)       # (N, 56)
    onehot = (iota == ids).astype(jnp.float32)                     # (N, 56)
    gi_all = jnp.dot(onehot, slab_ref[R_PROJ:R_PROJ + NI_PAD, :],
                     preferred_element_type=jnp.float32) + b_gi    # (N, 384)
    gi_bsh = gi_all.reshape(B, S, GW)                              # (B, S, 384)

    # ---- single-layer GRU recurrence (gates at lane offsets 0/128/256) ----
    # Padding-lane invariant: lanes [H:128) of each gate are exactly 0, so the
    # padding lanes of h stay 0 (sigmoid(0)=.5, tanh(0)=0, 0.5*0+0.5*0 = 0).
    w_hh = slab_ref[R_WHH:R_WHH + GL, :]                           # (128, 384)
    h = jnp.zeros((B, GL), jnp.float32)
    for t in range(S):                                             # unrolled
        gi = gi_bsh[:, t, :]                                       # (B, 384)
        gh = jnp.dot(h, w_hh, preferred_element_type=jnp.float32)  # (B, 384)
        r = jax.nn.sigmoid(gi[:, 0:GL]        + gh[:, 0:GL])
        z = jax.nn.sigmoid(gi[:, GL:2 * GL]   + gh[:, GL:2 * GL])
        n = jnp.tanh(gi[:, 2 * GL:3 * GL] + r * (gh[:, 2 * GL:3 * GL] + bhn))
        h = (1.0 - z) * n + z * h
        for b in range(B):                                         # b-major rows
            hs_ref[b * S + t:b * S + t + 1, :] = h[b:b + 1, :]

    rnn_flat = hs_ref[...]                                         # (N, 128)

    # ---- Encoder: tanh(Linear(rnn_dim -> hidden)) ----
    enc = jnp.tanh(jnp.dot(rnn_flat, slab_ref[R_WENC:R_WENC + GL, 0:Dh],
                           preferred_element_type=jnp.float32) + b_enc)  # (N,16)

    # ---- sample_latent: Linear(hidden -> 2*latent), mu / log_sigma ----
    temp = jnp.dot(enc, slab_ref[R_WLIN:R_WLIN + Dh, 0:2 * L],
                   preferred_element_type=jnp.float32) + b_lin     # (N, 32)
    mu        = temp[:, 0:L]                                       # (N, L)
    s_col     = jnp.exp(temp[:, L:L + 1])                          # (N, 1)
    std_row   = std_ref[0][:, 0:N]                                 # (1, N)
    # torch broadcast of (N, L) + (N,) adds along the LAST axis (valid: N == L)
    z_lat = mu + jnp.transpose(s_col) * std_row                    # (N, L)

    # ---- Decoder: Linear -> tanh -> Linear (output padded to 128 lanes) ----
    d1 = jnp.tanh(jnp.dot(z_lat, slab_ref[R_WD1:R_WD1 + L, 0:Dh],
                          preferred_element_type=jnp.float32) + b_d1)   # (N,16)
    d2 = jnp.dot(d1, slab_ref[R_WD2:R_WD2 + Dh, 0:GL],
                 preferred_element_type=jnp.float32) + b_d2             # (N,128)

    out_ref[...] = d2[None, :, :]                                  # lane-dense


# ------------------------------- params / packing ------------------------------
def init_params(key):
    ks = jax.random.split(key, 9)

    def xavier(k, shape):  # (out, in), matches nn.init.xavier_normal
        fan_out, fan_in = shape
        std = (2.0 / (fan_in + fan_out)) ** 0.5
        return std * jax.random.normal(k, shape, jnp.float32)

    return dict(
        item_embed=jax.random.normal(ks[0], (NUM_ITEMS, ITEM_EMBED), jnp.float32),
        gru_w_ih=0.1 * jax.random.normal(ks[1], (3 * RNN_DIM, ITEM_EMBED), jnp.float32),
        gru_w_hh=0.1 * jax.random.normal(ks[2], (3 * RNN_DIM, RNN_DIM), jnp.float32),
        gru_b_ih=0.1 * jax.random.normal(ks[3], (3 * RNN_DIM,), jnp.float32),
        gru_b_hh=0.1 * jax.random.normal(ks[4], (3 * RNN_DIM,), jnp.float32),
        enc_w=xavier(ks[5], (HIDDEN_DIM, RNN_DIM)),
        enc_b=jnp.zeros((HIDDEN_DIM,), jnp.float32),
        lin1_w=xavier(ks[6], (2 * LATENT_DIM, HIDDEN_DIM)),
        lin1_b=jnp.zeros((2 * LATENT_DIM,), jnp.float32),
        dec1_w=xavier(ks[7], (HIDDEN_DIM, LATENT_DIM)),
        dec1_b=jnp.zeros((HIDDEN_DIM,), jnp.float32),
        dec2_w=xavier(ks[8], (HIDDEN_DIM, LATENT_DIM)),
        dec2_b=jnp.zeros((HIDDEN_DIM,), jnp.float32),
    )


def pack_params(params):
    """One-time (outside jit) packing of ALL f32 parameters into a single slab.

    Gate layout: r -> lanes [0:128), z -> [128:256), n -> [256:384); real data
    occupies the first H (or Dh/L/2L) lanes of a block, everything else is 0.
    The embedding table is pre-multiplied into the GRU input projection.
    """
    Dh, L = HIDDEN_DIM, LATENT_DIM
    f32 = np.float32
    g = lambda a: np.asarray(a, dtype=f32)

    w_ih, w_hh = g(params["gru_w_ih"]), g(params["gru_w_hh"])
    b_ih, b_hh = g(params["gru_b_ih"]), g(params["gru_b_hh"])

    slab = np.zeros((R_TOTAL, GW), dtype=f32)

    # embedding folded into the input projection, gate-lane-aligned
    proj = g(params["item_embed"]) @ w_ih.T                       # (NUM_ITEMS, 3H)
    whh_t = w_hh.T                                                # (H, 3H)
    for gate in range(3):
        slab[R_PROJ:R_PROJ + NUM_ITEMS, gate * GL:gate * GL + H] = \
            proj[:, gate * H:(gate + 1) * H]
        slab[R_WHH:R_WHH + H, gate * GL:gate * GL + H] = \
            whh_t[:, gate * H:(gate + 1) * H]

    slab[R_WENC:R_WENC + H, 0:Dh]    = g(params["enc_w"]).T       # (H, Dh)
    slab[R_WLIN:R_WLIN + Dh, 0:2 * L] = g(params["lin1_w"]).T     # (Dh, 2L)
    slab[R_WD1:R_WD1 + L, 0:Dh]      = g(params["dec1_w"]).T      # (L, Dh)
    slab[R_WD2:R_WD2 + Dh, 0:Dh]     = g(params["dec2_w"]).T      # (Dh, Dh)

    # bias rows: b_hh pre-added into b_gi for the r/z gates (legal fold)
    for gate in range(3):
        hh = b_hh[gate * H:(gate + 1) * H] if gate < 2 else 0.0
        slab[R_BIAS, gate * GL:gate * GL + H] = b_ih[gate * H:(gate + 1) * H] + hh
    slab[R_BIAS + 1, 0:H]      = b_hh[2 * H:3 * H]                # n-gate hidden bias
    slab[R_BIAS + 2, 0:Dh]     = g(params["enc_b"])
    slab[R_BIAS + 3, 0:2 * L]  = g(params["lin1_b"])
    slab[R_BIAS + 4, 0:Dh]     = g(params["dec1_b"])
    slab[R_BIAS + 5, 0:Dh]     = g(params["dec2_b"])

    return jnp.asarray(slab)


# ------------------------------- wrapper / glue --------------------------------
@jax.jit
def svae_forward(x_ids, slab, std_z):
    """x_ids: (G, B, S) int32; slab: (R_TOTAL, GW) f32; std_z: (G, N) f32."""
    G = x_ids.shape[0]
    ids = x_ids.reshape(G, N, 1).astype(jnp.int32)                # b-major rows
    std_rows = jnp.zeros((G, 1, GL), jnp.float32).at[:, 0, :N].set(std_z)

    out = pl.pallas_call(
        svae_kernel,
        out_shape=jax.ShapeDtypeStruct((G, N, GL), jnp.float32),
        grid_spec=pltpu.PrefetchScalarGridSpec(
            num_scalar_prefetch=0,
            grid=(G,),
            in_specs=[
                pl.BlockSpec((1, N, 1), lambda g: (g, 0, 0)),      # ids
                pl.BlockSpec((1, 1, GL), lambda g: (g, 0, 0)),     # std noise
                pl.BlockSpec((R_TOTAL, GW), lambda g: (0, 0)),     # param slab
            ],
            out_specs=pl.BlockSpec((1, N, GL), lambda g: (g, 0, 0)),
            scratch_shapes=[pltpu.VMEM((N, GL), jnp.float32)],
        ),
        compiler_params=pltpu.CompilerParams(
            dimension_semantics=("parallel",)),
    )(ids, std_rows, slab)

    return out[:, :, :HIDDEN_DIM].reshape(G, BATCH, SEQ, HIDDEN_DIM)


# Pure-JAX reference mirroring the PyTorch forward exactly (one group).
def svae_reference(x_ids, params, std_z):
    B, S = x_ids.shape
    emb = params["item_embed"][x_ids.reshape(-1)].reshape(B, S, ITEM_EMBED)

    def step(h, x_t):
        gi = x_t @ params["gru_w_ih"].T + params["gru_b_ih"]
        gh = h @ params["gru_w_hh"].T + params["gru_b_hh"]
        r = jax.nn.sigmoid(gi[:, :H] + gh[:, :H])
        z = jax.nn.sigmoid(gi[:, H:2 * H] + gh[:, H:2 * H])
        n = jnp.tanh(gi[:, 2 * H:] + r * gh[:, 2 * H:])
        h_new = (1.0 - z) * n + z * h
        return h_new, h_new

    _, hs = lax.scan(step, jnp.zeros((B, H), jnp.float32),
                     jnp.transpose(emb, (1, 0, 2)))
    rnn = jnp.transpose(hs, (1, 0, 2)).reshape(B * S, H)
    enc = jnp.tanh(rnn @ params["enc_w"].T + params["enc_b"])
    temp = enc @ params["lin1_w"].T + params["lin1_b"]
    mu = temp[:, :LATENT_DIM]
    sigma = jnp.exp(temp[:, LATENT_DIM])
    z_lat = mu + sigma * std_z                  # (N,L) + (N,) broadcast, N == L
    d1 = jnp.tanh(z_lat @ params["dec1_w"].T + params["dec1_b"])
    d2 = d1 @ params["dec2_w"].T + params["dec2_b"]
    return d2.reshape(B, S, HIDDEN_DIM)


if __name__ == "__main__":
    key = jax.random.PRNGKey(0)
    kp, kx, kz = jax.random.split(key, 3)
    params = init_params(kp)
    slab = pack_params(params)          # one-time packing, outside jit

    x = jax.random.randint(kx, (GROUPS, BATCH, SEQ), 0, NUM_ITEMS, dtype=jnp.int32)
    # TODO(synk): torch draws std_z with np.random inside forward; here the noise
    # is drawn deterministically on the host and passed in as an input.
    std_z = jax.random.normal(kz, (GROUPS, N), jnp.float32)

    out = jax.block_until_ready(svae_forward(x, slab, std_z))
    ref = jnp.stack([svae_reference(x[g], params, std_z[g]) for g in range(GROUPS)])

    assert out.shape == (GROUPS, BATCH, SEQ, HIDDEN_DIM)
    assert bool(jnp.all(jnp.isfinite(out)))
    assert bool(jnp.allclose(out, ref, atol=2e-3, rtol=2e-3))
    print("KERNEL_OK")
</pallas_src>

<mosaic_0001>
module attributes {stable_mosaic.version = 11 : i64} {
  func.func @svae_kernel(%arg0: i32, %arg1: memref<1x16x1xi32, #tpu.memory_space<vmem>>, %arg2: memref<1x1x128xf32, #tpu.memory_space<vmem>>, %arg3: memref<368x384xf32, #tpu.memory_space<vmem>>, %arg4: memref<1x16x128xf32, #tpu.memory_space<vmem>>, %arg5: memref<16x128xf32, #tpu.memory_space<vmem>>) attributes {dimension_semantics = [#tpu.dimension_semantics<parallel>], iteration_bounds = array<i64: 4>, scalar_prefetch = 0 : i64, scratch_operands = 1 : i64, tpu.core_type = #tpu.core_type<tc>, window_params = [{transform_indices = @transform_0, window_bounds = array<i64: 1, 16, 1>}, {transform_indices = @transform_1, window_bounds = array<i64: 1, 1, 128>}, {pipeline_mode = #tpu.pipeline_mode<synchronous>, transform_indices = @transform_2, window_bounds = array<i64: 368, 384>}, {transform_indices = @transform_3, window_bounds = array<i64: 1, 16, 128>}]} {
    %c360 = arith.constant 360 : index
    %c0 = arith.constant 0 : index
    %0 = vector.load %arg3[%c360, %c0] : memref<368x384xf32, #tpu.memory_space<vmem>>, vector<8x384xf32>
    %1 = vector.extract_strided_slice %0 {offsets = [0, 0], sizes = [1, 384], strides = [1, 1]} : vector<8x384xf32> to vector<1x384xf32>
    %2 = vector.extract_strided_slice %0 {offsets = [1, 0], sizes = [1, 128], strides = [1, 1]} : vector<8x384xf32> to vector<1x128xf32>
    %3 = vector.shape_cast %2 : vector<1x128xf32> to vector<1x128xf32>
    %4 = vector.broadcast %3 : vector<1x128xf32> to vector<2x128xf32>
    %5 = vector.extract_strided_slice %0 {offsets = [2, 0], sizes = [1, 16], strides = [1, 1]} : vector<8x384xf32> to vector<1x16xf32>
    %6 = vector.extract_strided_slice %0 {offsets = [3, 0], sizes = [1, 32], strides = [1, 1]} : vector<8x384xf32> to vector<1x32xf32>
    %7 = vector.extract_strided_slice %0 {offsets = [4, 0], sizes = [1, 16], strides = [1, 1]} : vector<8x384xf32> to vector<1x16xf32>
    %8 = vector.extract_strided_slice %0 {offsets = [5, 0], sizes = [1, 128], strides = [1, 1]} : vector<8x384xf32> to vector<1x128xf32>
    %c0_0 = arith.constant 0 : index
    %c0_1 = arith.constant 0 : index
    %c0_2 = arith.constant 0 : index
    %9 = vector.load %arg1[%c0_0, %c0_1, %c0_2] : memref<1x16x1xi32, #tpu.memory_space<vmem>>, vector<1x16x1xi32>
    %10 = vector.shape_cast %9 : vector<1x16x1xi32> to vector<16x1xi32>
    %11 = tpu.iota {dimensions = array<i32: 1>} : vector<16x56xi32>
    %12 = vector.broadcast %10 : vector<16x1xi32> to vector<16x56xi32>
    %13 = arith.cmpi eq, %11, %12 : vector<16x56xi32>
    %14 = arith.extui %13 : vector<16x56xi1> to vector<16x56xi32>
    %15 = arith.sitofp %14 : vector<16x56xi32> to vector<16x56xf32>
    %c0_3 = arith.constant 0 : index
    %c0_4 = arith.constant 0 : index
    %16 = vector.load %arg3[%c0_3, %c0_4] : memref<368x384xf32, #tpu.memory_space<vmem>>, vector<56x384xf32>
    %cst = arith.constant dense<0.000000e+00> : vector<16x384xf32>
    %17 = tpu.matmul %15, %16, %cst {dimension_numbers = #tpu.dot_dimension_numbers<[1], [0], [0], [1], [0, 0, 1, 1], [], []>} : vector<16x56xf32>, vector<56x384xf32>, vector<16x384xf32> -> vector<16x384xf32>
    %18 = vector.broadcast %1 : vector<1x384xf32> to vector<16x384xf32>
    %19 = arith.addf %17, %18 : vector<16x384xf32>
    %20 = vector.shape_cast %19 : vector<16x384xf32> to vector<2x8x384xf32>
    %c56 = arith.constant 56 : index
    %c0_5 = arith.constant 0 : index
    %21 = vector.load %arg3[%c56, %c0_5] : memref<368x384xf32, #tpu.memory_space<vmem>>, vector<128x384xf32>
    %cst_6 = arith.constant 0.000000e+00 : f32
    %22 = vector.broadcast %cst_6 : f32 to vector<2x128xf32>
    %23 = vector.extract_strided_slice %20 {offsets = [0, 0, 0], sizes = [2, 1, 384], strides = [1, 1, 1]} : vector<2x8x384xf32> to vector<2x1x384xf32>
    %24 = vector.shape_cast %23 : vector<2x1x384xf32> to vector<2x384xf32>
    %cst_7 = arith.constant dense<0.000000e+00> : vector<2x384xf32>
    %25 = tpu.matmul %22, %21, %cst_7 {dimension_numbers = #tpu.dot_dimension_numbers<[1], [0], [0], [1], [0, 0, 1, 1], [], []>} : vector<2x128xf32>, vector<128x384xf32>, vector<2x384xf32> -> vector<2x384xf32>
    %26 = vector.extract_strided_slice %24 {offsets = [0, 0], sizes = [2, 128], strides = [1, 1]} : vector<2x384xf32> to vector<2x128xf32>
    %27 = vector.extract_strided_slice %25 {offsets = [0, 0], sizes = [2, 128], strides = [1, 1]} : vector<2x384xf32> to vector<2x128xf32>
    %28 = arith.addf %26, %27 : vector<2x128xf32>
    %29 = arith.negf %28 : vector<2x128xf32>
    %30 = math.exp %29 : vector<2x128xf32>
    %cst_8 = arith.constant 1.000000e+00 : f32
    %31 = vector.broadcast %cst_8 : f32 to vector<2x128xf32>
    %32 = arith.addf %31, %30 : vector<2x128xf32>
    %33 = arith.divf %31, %32 : vector<2x128xf32>
    %34 = vector.extract_strided_slice %24 {offsets = [0, 128], sizes = [2, 128], strides = [1, 1]} : vector<2x384xf32> to vector<2x128xf32>
    %35 = vector.extract_strided_slice %25 {offsets = [0, 128], sizes = [2, 128], strides = [1, 1]} : vector<2x384xf32> to vector<2x128xf32>
    %36 = arith.addf %34, %35 : vector<2x128xf32>
    %37 = arith.negf %36 : vector<2x128xf32>
    %38 = math.exp %37 : vector<2x128xf32>
    %cst_9 = arith.constant 1.000000e+00 : f32
    %39 = vector.broadcast %cst_9 : f32 to vector<2x128xf32>
    %40 = arith.addf %39, %38 : vector<2x128xf32>
    %41 = arith.divf %39, %40 : vector<2x128xf32>
    %42 = vector.extract_strided_slice %24 {offsets = [0, 256], sizes = [2, 128], strides = [1, 1]} : vector<2x384xf32> to vector<2x128xf32>
    %43 = vector.extract_strided_slice %25 {offsets = [0, 256], sizes = [2, 128], strides = [1, 1]} : vector<2x384xf32> to vector<2x128xf32>
    %44 = arith.addf %43, %4 : vector<2x128xf32>
    %45 = arith.mulf %33, %44 : vector<2x128xf32>
    %46 = arith.addf %42, %45 : vector<2x128xf32>
    %47 = math.tanh %46 : vector<2x128xf32>
    %cst_10 = arith.constant 1.000000e+00 : f32
    %48 = vector.broadcast %cst_10 : f32 to vector<2x128xf32>
    %49 = arith.subf %48, %41 : vector<2x128xf32>
    %50 = arith.mulf %49, %47 : vector<2x128xf32>
    %51 = arith.mulf %41, %22 : vector<2x128xf32>
    %52 = arith.addf %50, %51 : vector<2x128xf32>
    %53 = vector.extract_strided_slice %52 {offsets = [0, 0], sizes = [1, 128], strides = [1, 1]} : vector<2x128xf32> to vector<1x128xf32>
    %c0_11 = arith.constant 0 : index
    %c0_12 = arith.constant 0 : index
    %54 = vector.load %arg5[%c0_11, %c0_12] : memref<16x128xf32, #tpu.memory_space<vmem>>, vector<1x128xf32>
    tpu.vector_store %arg5[%c0_11, %c0_12], %53 {strides = array<i32>} : memref<16x128xf32, #tpu.memory_space<vmem>>, vector<1x128xf32>,
    %55 = vector.extract_strided_slice %52 {offsets = [1, 0], sizes = [1, 128], strides = [1, 1]} : vector<2x128xf32> to vector<1x128xf32>
    %c8 = arith.constant 8 : index
    %c0_13 = arith.constant 0 : index
    %56 = vector.load %arg5[%c8, %c0_13] : memref<16x128xf32, #tpu.memory_space<vmem>>, vector<1x128xf32>
    tpu.vector_store %arg5[%c8, %c0_13], %55 {strides = array<i32>} : memref<16x128xf32, #tpu.memory_space<vmem>>, vector<1x128xf32>,
    %57 = vector.extract_strided_slice %20 {offsets = [0, 1, 0], sizes = [2, 1, 384], strides = [1, 1, 1]} : vector<2x8x384xf32> to vector<2x1x384xf32>
    %58 = vector.shape_cast %57 : vector<2x1x384xf32> to vector<2x384xf32>
    %cst_14 = arith.constant dense<0.000000e+00> : vector<2x384xf32>
    %59 = tpu.matmul %52, %21, %cst_14 {dimension_numbers = #tpu.dot_dimension_numbers<[1], [0], [0], [1], [0, 0, 1, 1], [], []>} : vector<2x128xf32>, vector<128x384xf32>, vector<2x384xf32> -> vector<2x384xf32>
    %60 = vector.extract_strided_slice %58 {offsets = [0, 0], sizes = [2, 128], strides = [1, 1]} : vector<2x384xf32> to vector<2x128xf32>
    %61 = vector.extract_strided_slice %59 {offsets = [0, 0], sizes = [2, 128], strides = [1, 1]} : vector<2x384xf32> to vector<2x128xf32>
    %62 = arith.addf %60, %61 : vector<2x128xf32>
    %63 = arith.negf %62 : vector<2x128xf32>
    %64 = math.exp %63 : vector<2x128xf32>
    %cst_15 = arith.constant 1.000000e+00 : f32
    %65 = vector.broadcast %cst_15 : f32 to vector<2x128xf32>
    %66 = arith.addf %65, %64 : vector<2x128xf32>
    %67 = arith.divf %65, %66 : vector<2x128xf32>
    %68 = vector.extract_strided_slice %58 {offsets = [0, 128], sizes = [2, 128], strides = [1, 1]} : vector<2x384xf32> to vector<2x128xf32>
    %69 = vector.extract_strided_slice %59 {offsets = [0, 128], sizes = [2, 128], strides = [1, 1]} : vector<2x384xf32> to vector<2x128xf32>
    %70 = arith.addf %68, %69 : vector<2x128xf32>
    %71 = arith.negf %70 : vector<2x128xf32>
    %72 = math.exp %71 : vector<2x128xf32>
    %cst_16 = arith.constant 1.000000e+00 : f32
    %73 = vector.broadcast %cst_16 : f32 to vector<2x128xf32>
    %74 = arith.addf %73, %72 : vector<2x128xf32>
    %75 = arith.divf %73, %74 : vector<2x128xf32>
    %76 = vector.extract_strided_slice %58 {offsets = [0, 256], sizes = [2, 128], strides = [1, 1]} : vector<2x384xf32> to vector<2x128xf32>
    %77 = vector.extract_strided_slice %59 {offsets = [0, 256], sizes = [2, 128], strides = [1, 1]} : vector<2x384xf32> to vector<2x128xf32>
    %78 = arith.addf %77, %4 : vector<2x128xf32>
    %79 = arith.mulf %67, %78 : vector<2x128xf32>
    %80 = arith.addf %76, %79 : vector<2x128xf32>
    %81 = math.tanh %80 : vector<2x128xf32>
    %cst_17 = arith.constant 1.000000e+00 : f32
    %82 = vector.broadcast %cst_17 : f32 to vector<2x128xf32>
    %83 = arith.subf %82, %75 : vector<2x128xf32>
    %84 = arith.mulf %83, %81 : vector<2x128xf32>
    %85 = arith.mulf %75, %52 : vector<2x128xf32>
    %86 = arith.addf %84, %85 : vector<2x128xf32>
    %87 = vector.extract_strided_slice %86 {offsets = [0, 0], sizes = [1, 128], strides = [1, 1]} : vector<2x128xf32> to vector<1x128xf32>
    %c1 = arith.constant 1 : index
    %c0_18 = arith.constant 0 : index
    %88 = vector.load %arg5[%c1, %c0_18] : memref<16x128xf32, #tpu.memory_space<vmem>>, vector<1x128xf32>
    tpu.vector_store %arg5[%c1, %c0_18], %87 {strides = array<i32>} : memref<16x128xf32, #tpu.memory_space<vmem>>, vector<1x128xf32>,
    %89 = vector.extract_strided_slice %86 {offsets = [1, 0], sizes = [1, 128], strides = [1, 1]} : vector<2x128xf32> to vector<1x128xf32>
    %c9 = arith.constant 9 : index
    %c0_19 = arith.constant 0 : index
    %90 = vector.load %arg5[%c9, %c0_19] : memref<16x128xf32, #tpu.memory_space<vmem>>, vector<1x128xf32>
    tpu.vector_store %arg5[%c9, %c0_19], %89 {strides = array<i32>} : memref<16x128xf32, #tpu.memory_space<vmem>>, vector<1x128xf32>,
    %91 = vector.extract_strided_slice %20 {offsets = [0, 2, 0], sizes = [2, 1, 384], strides = [1, 1, 1]} : vector<2x8x384xf32> to vector<2x1x384xf32>
    %92 = vector.shape_cast %91 : vector<2x1x384xf32> to vector<2x384xf32>
    %cst_20 = arith.constant dense<0.000000e+00> : vector<2x384xf32>
    %93 = tpu.matmul %86, %21, %cst_20 {dimension_numbers = #tpu.dot_dimension_numbers<[1], [0], [0], [1], [0, 0, 1, 1], [], []>} : vector<2x128xf32>, vector<128x384xf32>, vector<2x384xf32> -> vector<2x384xf32>
    %94 = vector.extract_strided_slice %92 {offsets = [0, 0], sizes = [2, 128], strides = [1, 1]} : vector<2x384xf32> to vector<2x128xf32>
    %95 = vector.extract_strided_slice %93 {offsets = [0, 0], sizes = [2, 128], strides = [1, 1]} : vector<2x384xf32> to vector<2x128xf32>
    %96 = arith.addf %94, %95 : vector<2x128xf32>
    %97 = arith.negf %96 : vector<2x128xf32>
    %98 = math.exp %97 : vector<2x128xf32>
    %cst_21 = arith.constant 1.000000e+00 : f32
    %99 = vector.broadcast %cst_21 : f32 to vector<2x128xf32>
    %100 = arith.addf %99, %98 : vector<2x128xf32>
    %101 = arith.divf %99, %100 : vector<2x128xf32>
    %102 = vector.extract_strided_slice %92 {offsets = [0, 128], sizes = [2, 128], strides = [1, 1]} : vector<2x384xf32> to vector<2x128xf32>
    %103 = vector.extract_strided_slice %93 {offsets = [0, 128], sizes = [2, 128], strides = [1, 1]} : vector<2x384xf32> to vector<2x128xf32>
    %104 = arith.addf %102, %103 : vector<2x128xf32>
    %105 = arith.negf %104 : vector<2x128xf32>
    %106 = math.exp %105 : vector<2x128xf32>
    %cst_22 = arith.constant 1.000000e+00 : f32
    %107 = vector.broadcast %cst_22 : f32 to vector<2x128xf32>
    %108 = arith.addf %107, %106 : vector<2x128xf32>
    %109 = arith.divf %107, %108 : vector<2x128xf32>
    %110 = vector.extract_strided_slice %92 {offsets = [0, 256], sizes = [2, 128], strides = [1, 1]} : vector<2x384xf32> to vector<2x128xf32>
    %111 = vector.extract_strided_slice %93 {offsets = [0, 256], sizes = [2, 128], strides = [1, 1]} : vector<2x384xf32> to vector<2x128xf32>
    %112 = arith.addf %111, %4 : vector<2x128xf32>
    %113 = arith.mulf %101, %112 : vector<2x128xf32>
    %114 = arith.addf %110, %113 : vector<2x128xf32>
    %115 = math.tanh %114 : vector<2x128xf32>
    %cst_23 = arith.constant 1.000000e+00 : f32
    %116 = vector.broadcast %cst_23 : f32 to vector<2x128xf32>
    %117 = arith.subf %116, %109 : vector<2x128xf32>
    %118 = arith.mulf %117, %115 : vector<2x128xf32>
    %119 = arith.mulf %109, %86 : vector<2x128xf32>
    %120 = arith.addf %118, %119 : vector<2x128xf32>
    %121 = vector.extract_strided_slice %120 {offsets = [0, 0], sizes = [1, 128], strides = [1, 1]} : vector<2x128xf32> to vector<1x128xf32>
    %c2 = arith.constant 2 : index
    %c0_24 = arith.constant 0 : index
    %122 = vector.load %arg5[%c2, %c0_24] : memref<16x128xf32, #tpu.memory_space<vmem>>, vector<1x128xf32>
    tpu.vector_store %arg5[%c2, %c0_24], %121 {strides = array<i32>} : memref<16x128xf32, #tpu.memory_space<vmem>>, vector<1x128xf32>,
    %123 = vector.extract_strided_slice %120 {offsets = [1, 0], sizes = [1, 128], strides = [1, 1]} : vector<2x128xf32> to vector<1x128xf32>
    %c10 = arith.constant 10 : index
    %c0_25 = arith.constant 0 : index
    %124 = vector.load %arg5[%c10, %c0_25] : memref<16x128xf32, #tpu.memory_space<vmem>>, vector<1x128xf32>
    tpu.vector_store %arg5[%c10, %c0_25], %123 {strides = array<i32>} : memref<16x128xf32, #tpu.memory_space<vmem>>, vector<1x128xf32>,
    %125 = vector.extract_strided_slice %20 {offsets = [0, 3, 0], sizes = [2, 1, 384], strides = [1, 1, 1]} : vector<2x8x384xf32> to vector<2x1x384xf32>
    %126 = vector.shape_cast %125 : vector<2x1x384xf32> to vector<2x384xf32>
    %cst_26 = arith.constant dense<0.000000e+00> : vector<2x384xf32>
    %127 = tpu.matmul %120, %21, %cst_26 {dimension_numbers = #tpu.dot_dimension_numbers<[1], [0], [0], [1], [0, 0, 1, 1], [], []>} : vector<2x128xf32>, vector<128x384xf32>, vector<2x384xf32> -> vector<2x384xf32>
    %128 = vector.extract_strided_slice %126 {offsets = [0, 0], sizes = [2, 128], strides = [1, 1]} : vector<2x384xf32> to vector<2x128xf32>
    %129 = vector.extract_strided_slice %127 {offsets = [0, 0], sizes = [2, 128], strides = [1, 1]} : vector<2x384xf32> to vector<2x128xf32>
    %130 = arith.addf %128, %129 : vector<2x128xf32>
    %131 = arith.negf %130 : vector<2x128xf32>
    %132 = math.exp %131 : vector<2x128xf32>
    %cst_27 = arith.constant 1.000000e+00 : f32
    %133 = vector.broadcast %cst_27 : f32 to vector<2x128xf32>
    %134 = arith.addf %133, %132 : vector<2x128xf32>
    %135 = arith.divf %133, %134 : vector<2x128xf32>
    %136 = vector.extract_strided_slice %126 {offsets = [0, 128], sizes = [2, 128], strides = [1, 1]} : vector<2x384xf32> to vector<2x128xf32>
    %137 = vector.extract_strided_slice %127 {offsets = [0, 128], sizes = [2, 128], strides = [1, 1]} : vector<2x384xf32> to vector<2x128xf32>
    %138 = arith.addf %136, %137 : vector<2x128xf32>
    %139 = arith.negf %138 : vector<2x128xf32>
    %140 = math.exp %139 : vector<2x128xf32>
    %cst_28 = arith.constant 1.000000e+00 : f32
    %141 = vector.broadcast %cst_28 : f32 to vector<2x128xf32>
    %142 = arith.addf %141, %140 : vector<2x128xf32>
    %143 = arith.divf %141, %142 : vector<2x128xf32>
    %144 = vector.extract_strided_slice %126 {offsets = [0, 256], sizes = [2, 128], strides = [1, 1]} : vector<2x384xf32> to vector<2x128xf32>
    %145 = vector.extract_strided_slice %127 {offsets = [0, 256], sizes = [2, 128], strides = [1, 1]} : vector<2x384xf32> to vector<2x128xf32>
    %146 = arith.addf %145, %4 : vector<2x128xf32>
    %147 = arith.mulf %135, %146 : vector<2x128xf32>
    %148 = arith.addf %144, %147 : vector<2x128xf32>
    %149 = math.tanh %148 : vector<2x128xf32>
    %cst_29 = arith.constant 1.000000e+00 : f32
    %150 = vector.broadcast %cst_29 : f32 to vector<2x128xf32>
    %151 = arith.subf %150, %143 : vector<2x128xf32>
    %152 = arith.mulf %151, %149 : vector<2x128xf32>
    %153 = arith.mulf %143, %120 : vector<2x128xf32>
    %154 = arith.addf %152, %153 : vector<2x128xf32>
    %155 = vector.extract_strided_slice %154 {offsets = [0, 0], sizes = [1, 128], strides = [1, 1]} : vector<2x128xf32> to vector<1x128xf32>
    %c3 = arith.constant 3 : index
    %c0_30 = arith.constant 0 : index
    %156 = vector.load %arg5[%c3, %c0_30] : memref<16x128xf32, #tpu.memory_space<vmem>>, vector<1x128xf32>
    tpu.vector_store %arg5[%c3, %c0_30], %155 {strides = array<i32>} : memref<16x128xf32, #tpu.memory_space<vmem>>, vector<1x128xf32>,
    %157 = vector.extract_strided_slice %154 {offsets = [1, 0], sizes = [1, 128], strides = [1, 1]} : vector<2x128xf32> to vector<1x128xf32>
    %c11 = arith.constant 11 : index
    %c0_31 = arith.constant 0 : index
    %158 = vector.load %arg5[%c11, %c0_31] : memref<16x128xf32, #tpu.memory_space<vmem>>, vector<1x128xf32>
    tpu.vector_store %arg5[%c11, %c0_31], %157 {strides = array<i32>} : memref<16x128xf32, #tpu.memory_space<vmem>>, vector<1x128xf32>,
    %159 = vector.extract_strided_slice %20 {offsets = [0, 4, 0], sizes = [2, 1, 384], strides = [1, 1, 1]} : vector<2x8x384xf32> to vector<2x1x384xf32>
    %160 = vector.shape_cast %159 : vector<2x1x384xf32> to vector<2x384xf32>
    %cst_32 = arith.constant dense<0.000000e+00> : vector<2x384xf32>
    %161 = tpu.matmul %154, %21, %cst_32 {dimension_numbers = #tpu.dot_dimension_numbers<[1], [0], [0], [1], [0, 0, 1, 1], [], []>} : vector<2x128xf32>, vector<128x384xf32>, vector<2x384xf32> -> vector<2x384xf32>
    %162 = vector.extract_strided_slice %160 {offsets = [0, 0], sizes = [2, 128], strides = [1, 1]} : vector<2x384xf32> to vector<2x128xf32>
    %163 = vector.extract_strided_slice %161 {offsets = [0, 0], sizes = [2, 128], strides = [1, 1]} : vector<2x384xf32> to vector<2x128xf32>
    %164 = arith.addf %162, %163 : vector<2x128xf32>
    %165 = arith.negf %164 : vector<2x128xf32>
    %166 = math.exp %165 : vector<2x128xf32>
    %cst_33 = arith.constant 1.000000e+00 : f32
    %167 = vector.broadcast %cst_33 : f32 to vector<2x128xf32>
    %168 = arith.addf %167, %166 : vector<2x128xf32>
    %169 = arith.divf %167, %168 : vector<2x128xf32>
    %170 = vector.extract_strided_slice %160 {offsets = [0, 128], sizes = [2, 128], strides = [1, 1]} : vector<2x384xf32> to vector<2x128xf32>
    %171 = vector.extract_strided_slice %161 {offsets = [0, 128], sizes = [2, 128], strides = [1, 1]} : vector<2x384xf32> to vector<2x128xf32>
    %172 = arith.addf %170, %171 : vector<2x128xf32>
    %173 = arith.negf %172 : vector<2x128xf32>
    %174 = math.exp %173 : vector<2x128xf32>
    %cst_34 = arith.constant 1.000000e+00 : f32
    %175 = vector.broadcast %cst_34 : f32 to vector<2x128xf32>
    %176 = arith.addf %175, %174 : vector<2x128xf32>
    %177 = arith.divf %175, %176 : vector<2x128xf32>
    %178 = vector.extract_strided_slice %160 {offsets = [0, 256], sizes = [2, 128], strides = [1, 1]} : vector<2x384xf32> to vector<2x128xf32>
    %179 = vector.extract_strided_slice %161 {offsets = [0, 256], sizes = [2, 128], strides = [1, 1]} : vector<2x384xf32> to vector<2x128xf32>
    %180 = arith.addf %179, %4 : vector<2x128xf32>
    %181 = arith.mulf %169, %180 : vector<2x128xf32>
    %182 = arith.addf %178, %181 : vector<2x128xf32>
    %183 = math.tanh %182 : vector<2x128xf32>
    %cst_35 = arith.constant 1.000000e+00 : f32
    %184 = vector.broadcast %cst_35 : f32 to vector<2x128xf32>
    %185 = arith.subf %184, %177 : vector<2x128xf32>
    %186 = arith.mulf %185, %183 : vector<2x128xf32>
    %187 = arith.mulf %177, %154 : vector<2x128xf32>
    %188 = arith.addf %186, %187 : vector<2x128xf32>
    %189 = vector.extract_strided_slice %188 {offsets = [0, 0], sizes = [1, 128], strides = [1, 1]} : vector<2x128xf32> to vector<1x128xf32>
    %c4 = arith.constant 4 : index
    %c0_36 = arith.constant 0 : index
    %190 = vector.load %arg5[%c4, %c0_36] : memref<16x128xf32, #tpu.memory_space<vmem>>, vector<1x128xf32>
    tpu.vector_store %arg5[%c4, %c0_36], %189 {strides = array<i32>} : memref<16x128xf32, #tpu.memory_space<vmem>>, vector<1x128xf32>,
    %191 = vector.extract_strided_slice %188 {offsets = [1, 0], sizes = [1, 128], strides = [1, 1]} : vector<2x128xf32> to vector<1x128xf32>
    %c12 = arith.constant 12 : index
    %c0_37 = arith.constant 0 : index
    %192 = vector.load %arg5[%c12, %c0_37] : memref<16x128xf32, #tpu.memory_space<vmem>>, vector<1x128xf32>
    tpu.vector_store %arg5[%c12, %c0_37], %191 {strides = array<i32>} : memref<16x128xf32, #tpu.memory_space<vmem>>, vector<1x128xf32>,
    %193 = vector.extract_strided_slice %20 {offsets = [0, 5, 0], sizes = [2, 1, 384], strides = [1, 1, 1]} : vector<2x8x384xf32> to vector<2x1x384xf32>
    %194 = vector.shape_cast %193 : vector<2x1x384xf32> to vector<2x384xf32>
    %cst_38 = arith.constant dense<0.000000e+00> : vector<2x384xf32>
    %195 = tpu.matmul %188, %21, %cst_38 {dimension_numbers = #tpu.dot_dimension_numbers<[1], [0], [0], [1], [0, 0, 1, 1], [], []>} : vector<2x128xf32>, vector<128x384xf32>, vector<2x384xf32> -> vector<2x384xf32>
    %196 = vector.extract_strided_slice %194 {offsets = [0, 0], sizes = [2, 128], strides = [1, 1]} : vector<2x384xf32> to vector<2x128xf32>
    %197 = vector.extract_strided_slice %195 {offsets = [0, 0], sizes = [2, 128], strides = [1, 1]} : vector<2x384xf32> to vector<2x128xf32>
    %198 = arith.addf %196, %197 : vector<2x128xf32>
    %199 = arith.negf %198 : vector<2x128xf32>
    %200 = math.exp %199 : vector<2x128xf32>
    %cst_39 = arith.constant 1.000000e+00 : f32
    %201 = vector.broadcast %cst_39 : f32 to vector<2x128xf32>
    %202 = arith.addf %201, %200 : vector<2x128xf32>
    %203 = arith.divf %201, %202 : vector<2x128xf32>
    %204 = vector.extract_strided_slice %194 {offsets = [0, 128], sizes = [2, 128], strides = [1, 1]} : vector<2x384xf32> to vector<2x128xf32>
    %205 = vector.extract_strided_slice %195 {offsets = [0, 128], sizes = [2, 128], strides = [1, 1]} : vector<2x384xf32> to vector<2x128xf32>
    %206 = arith.addf %204, %205 : vector<2x128xf32>
    %207 = arith.negf %206 : vector<2x128xf32>
    %208 = math.exp %207 : vector<2x128xf32>
    %cst_40 = arith.constant 1.000000e+00 : f32
    %209 = vector.broadcast %cst_40 : f32 to vector<2x128xf32>
    %210 = arith.addf %209, %208 : vector<2x128xf32>
    %211 = arith.divf %209, %210 : vector<2x128xf32>
    %212 = vector.extract_strided_slice %194 {offsets = [0, 256], sizes = [2, 128], strides = [1, 1]} : vector<2x384xf32> to vector<2x128xf32>
    %213 = vector.extract_strided_slice %195 {offsets = [0, 256], sizes = [2, 128], strides = [1, 1]} : vector<2x384xf32> to vector<2x128xf32>
    %214 = arith.addf %213, %4 : vector<2x128xf32>
    %215 = arith.mulf %203, %214 : vector<2x128xf32>
    %216 = arith.addf %212, %215 : vector<2x128xf32>
    %217 = math.tanh %216 : vector<2x128xf32>
    %cst_41 = arith.constant 1.000000e+00 : f32
    %218 = vector.broadcast %cst_41 : f32 to vector<2x128xf32>
    %219 = arith.subf %218, %211 : vector<2x128xf32>
    %220 = arith.mulf %219, %217 : vector<2x128xf32>
    %221 = arith.mulf %211, %188 : vector<2x128xf32>
    %222 = arith.addf %220, %221 : vector<2x128xf32>
    %223 = vector.extract_strided_slice %222 {offsets = [0, 0], sizes = [1, 128], strides = [1, 1]} : vector<2x128xf32> to vector<1x128xf32>
    %c5 = arith.constant 5 : index
    %c0_42 = arith.constant 0 : index
    %224 = vector.load %arg5[%c5, %c0_42] : memref<16x128xf32, #tpu.memory_space<vmem>>, vector<1x128xf32>
    tpu.vector_store %arg5[%c5, %c0_42], %223 {strides = array<i32>} : memref<16x128xf32, #tpu.memory_space<vmem>>, vector<1x128xf32>,
    %225 = vector.extract_strided_slice %222 {offsets = [1, 0], sizes = [1, 128], strides = [1, 1]} : vector<2x128xf32> to vector<1x128xf32>
    %c13 = arith.constant 13 : index
    %c0_43 = arith.constant 0 : index
    %226 = vector.load %arg5[%c13, %c0_43] : memref<16x128xf32, #tpu.memory_space<vmem>>, vector<1x128xf32>
    tpu.vector_store %arg5[%c13, %c0_43], %225 {strides = array<i32>} : memref<16x128xf32, #tpu.memory_space<vmem>>, vector<1x128xf32>,
    %227 = vector.extract_strided_slice %20 {offsets = [0, 6, 0], sizes = [2, 1, 384], strides = [1, 1, 1]} : vector<2x8x384xf32> to vector<2x1x384xf32>
    %228 = vector.shape_cast %227 : vector<2x1x384xf32> to vector<2x384xf32>
    %cst_44 = arith.constant dense<0.000000e+00> : vector<2x384xf32>
    %229 = tpu.matmul %222, %21, %cst_44 {dimension_numbers = #tpu.dot_dimension_numbers<[1], [0], [0], [1], [0, 0, 1, 1], [], []>} : vector<2x128xf32>, vector<128x384xf32>, vector<2x384xf32> -> vector<2x384xf32>
    %230 = vector.extract_strided_slice %228 {offsets = [0, 0], sizes = [2, 128], strides = [1, 1]} : vector<2x384xf32> to vector<2x128xf32>
    %231 = vector.extract_strided_slice %229 {offsets = [0, 0], sizes = [2, 128], strides = [1, 1]} : vector<2x384xf32> to vector<2x128xf32>
    %232 = arith.addf %230, %231 : vector<2x128xf32>
    %233 = arith.negf %232 : vector<2x128xf32>
    %234 = math.exp %233 : vector<2x128xf32>
    %cst_45 = arith.constant 1.000000e+00 : f32
    %235 = vector.broadcast %cst_45 : f32 to vector<2x128xf32>
    %236 = arith.addf %235, %234 : vector<2x128xf32>
    %237 = arith.divf %235, %236 : vector<2x128xf32>
    %238 = vector.extract_strided_slice %228 {offsets = [0, 128], sizes = [2, 128], strides = [1, 1]} : vector<2x384xf32> to vector<2x128xf32>
    %239 = vector.extract_strided_slice %229 {offsets = [0, 128], sizes = [2, 128], strides = [1, 1]} : vector<2x384xf32> to vector<2x128xf32>
    %240 = arith.addf %238, %239 : vector<2x128xf32>
    %241 = arith.negf %240 : vector<2x128xf32>
    %242 = math.exp %241 : vector<2x128xf32>
    %cst_46 = arith.constant 1.000000e+00 : f32
    %243 = vector.broadcast %cst_46 : f32 to vector<2x128xf32>
    %244 = arith.addf %243, %242 : vector<2x128xf32>
    %245 = arith.divf %243, %244 : vector<2x128xf32>
    %246 = vector.extract_strided_slice %228 {offsets = [0, 256], sizes = [2, 128], strides = [1, 1]} : vector<2x384xf32> to vector<2x128xf32>
    %247 = vector.extract_strided_slice %229 {offsets = [0, 256], sizes = [2, 128], strides = [1, 1]} : vector<2x384xf32> to vector<2x128xf32>
    %248 = arith.addf %247, %4 : vector<2x128xf32>
    %249 = arith.mulf %237, %248 : vector<2x128xf32>
    %250 = arith.addf %246, %249 : vector<2x128xf32>
    %251 = math.tanh %250 : vector<2x128xf32>
    %cst_47 = arith.constant 1.000000e+00 : f32
    %252 = vector.broadcast %cst_47 : f32 to vector<2x128xf32>
    %253 = arith.subf %252, %245 : vector<2x128xf32>
    %254 = arith.mulf %253, %251 : vector<2x128xf32>
    %255 = arith.mulf %245, %222 : vector<2x128xf32>
    %256 = arith.addf %254, %255 : vector<2x128xf32>
    %257 = vector.extract_strided_slice %256 {offsets = [0, 0], sizes = [1, 128], strides = [1, 1]} : vector<2x128xf32> to vector<1x128xf32>
    %c6 = arith.constant 6 : index
    %c0_48 = arith.constant 0 : index
    %258 = vector.load %arg5[%c6, %c0_48] : memref<16x128xf32, #tpu.memory_space<vmem>>, vector<1x128xf32>
    tpu.vector_store %arg5[%c6, %c0_48], %257 {strides = array<i32>} : memref<16x128xf32, #tpu.memory_space<vmem>>, vector<1x128xf32>,
    %259 = vector.extract_strided_slice %256 {offsets = [1, 0], sizes = [1, 128], strides = [1, 1]} : vector<2x128xf32> to vector<1x128xf32>
    %c14 = arith.constant 14 : index
    %c0_49 = arith.constant 0 : index
    %260 = vector.load %arg5[%c14, %c0_49] : memref<16x128xf32, #tpu.memory_space<vmem>>, vector<1x128xf32>
    tpu.vector_store %arg5[%c14, %c0_49], %259 {strides = array<i32>} : memref<16x128xf32, #tpu.memory_space<vmem>>, vector<1x128xf32>,
    %261 = vector.extract_strided_slice %20 {offsets = [0, 7, 0], sizes = [2, 1, 384], strides = [1, 1, 1]} : vector<2x8x384xf32> to vector<2x1x384xf32>
    %262 = vector.shape_cast %261 : vector<2x1x384xf32> to vector<2x384xf32>
    %cst_50 = arith.constant dense<0.000000e+00> : vector<2x384xf32>
    %263 = tpu.matmul %256, %21, %cst_50 {dimension_numbers = #tpu.dot_dimension_numbers<[1], [0], [0], [1], [0, 0, 1, 1], [], []>} : vector<2x128xf32>, vector<128x384xf32>, vector<2x384xf32> -> vector<2x384xf32>
    %264 = vector.extract_strided_slice %262 {offsets = [0, 0], sizes = [2, 128], strides = [1, 1]} : vector<2x384xf32> to vector<2x128xf32>
    %265 = vector.extract_strided_slice %263 {offsets = [0, 0], sizes = [2, 128], strides = [1, 1]} : vector<2x384xf32> to vector<2x128xf32>
    %266 = arith.addf %264, %265 : vector<2x128xf32>
    %267 = arith.negf %266 : vector<2x128xf32>
    %268 = math.exp %267 : vector<2x128xf32>
    %cst_51 = arith.constant 1.000000e+00 : f32
    %269 = vector.broadcast %cst_51 : f32 to vector<2x128xf32>
    %270 = arith.addf %269, %268 : vector<2x128xf32>
    %271 = arith.divf %269, %270 : vector<2x128xf32>
    %272 = vector.extract_strided_slice %262 {offsets = [0, 128], sizes = [2, 128], strides = [1, 1]} : vector<2x384xf32> to vector<2x128xf32>
    %273 = vector.extract_strided_slice %263 {offsets = [0, 128], sizes = [2, 128], strides = [1, 1]} : vector<2x384xf32> to vector<2x128xf32>
    %274 = arith.addf %272, %273 : vector<2x128xf32>
    %275 = arith.negf %274 : vector<2x128xf32>
    %276 = math.exp %275 : vector<2x128xf32>
    %cst_52 = arith.constant 1.000000e+00 : f32
    %277 = vector.broadcast %cst_52 : f32 to vector<2x128xf32>
    %278 = arith.addf %277, %276 : vector<2x128xf32>
    %279 = arith.divf %277, %278 : vector<2x128xf32>
    %280 = vector.extract_strided_slice %262 {offsets = [0, 256], sizes = [2, 128], strides = [1, 1]} : vector<2x384xf32> to vector<2x128xf32>
    %281 = vector.extract_strided_slice %263 {offsets = [0, 256], sizes = [2, 128], strides = [1, 1]} : vector<2x384xf32> to vector<2x128xf32>
    %282 = arith.addf %281, %4 : vector<2x128xf32>
    %283 = arith.mulf %271, %282 : vector<2x128xf32>
    %284 = arith.addf %280, %283 : vector<2x128xf32>
    %285 = math.tanh %284 : vector<2x128xf32>
    %cst_53 = arith.constant 1.000000e+00 : f32
    %286 = vector.broadcast %cst_53 : f32 to vector<2x128xf32>
    %287 = arith.subf %286, %279 : vector<2x128xf32>
    %288 = arith.mulf %287, %285 : vector<2x128xf32>
    %289 = arith.mulf %279, %256 : vector<2x128xf32>
    %290 = arith.addf %288, %289 : vector<2x128xf32>
    %291 = vector.extract_strided_slice %290 {offsets = [0, 0], sizes = [1, 128], strides = [1, 1]} : vector<2x128xf32> to vector<1x128xf32>
    %c7 = arith.constant 7 : index
    %c0_54 = arith.constant 0 : index
    %292 = vector.load %arg5[%c7, %c0_54] : memref<16x128xf32, #tpu.memory_space<vmem>>, vector<1x128xf32>
    tpu.vector_store %arg5[%c7, %c0_54], %291 {strides = array<i32>} : memref<16x128xf32, #tpu.memory_space<vmem>>, vector<1x128xf32>,
    %293 = vector.extract_strided_slice %290 {offsets = [1, 0], sizes = [1, 128], strides = [1, 1]} : vector<2x128xf32> to vector<1x128xf32>
    %c15 = arith.constant 15 : index
    %c0_55 = arith.constant 0 : index
    %294 = vector.load %arg5[%c15, %c0_55] : memref<16x128xf32, #tpu.memory_space<vmem>>, vector<1x128xf32>
    tpu.vector_store %arg5[%c15, %c0_55], %293 {strides = array<i32>} : memref<16x128xf32, #tpu.memory_space<vmem>>, vector<1x128xf32>,
    %c0_56 = arith.constant 0 : index
    %c0_57 = arith.constant 0 : index
    %295 = vector.load %arg5[%c0_56, %c0_57] : memref<16x128xf32, #tpu.memory_space<vmem>>, vector<16x128xf32>
    %c184 = arith.constant 184 : index
    %c0_58 = arith.constant 0 : index
    %296 = vector.load %arg3[%c184, %c0_58] : memref<368x384xf32, #tpu.memory_space<vmem>>, vector<128x16xf32>
    %cst_59 = arith.constant dense<0.000000e+00> : vector<16x16xf32>
    %297 = tpu.matmul %295, %296, %cst_59 {dimension_numbers = #tpu.dot_dimension_numbers<[1], [0], [0], [1], [0, 0, 1, 1], [], []>} : vector<16x128xf32>, vector<128x16xf32>, vector<16x16xf32> -> vector<16x16xf32>
    %298 = vector.broadcast %5 : vector<1x16xf32> to vector<16x16xf32>
    %299 = arith.addf %297, %298 : vector<16x16xf32>
    %300 = math.tanh %299 : vector<16x16xf32>
    %c312 = arith.constant 312 : index
    %c0_60 = arith.constant 0 : index
    %301 = vector.load %arg3[%c312, %c0_60] : memref<368x384xf32, #tpu.memory_space<vmem>>, vector<16x32xf32>
    %cst_61 = arith.constant dense<0.000000e+00> : vector<16x32xf32>
    %302 = tpu.matmul %300, %301, %cst_61 {dimension_numbers = #tpu.dot_dimension_numbers<[1], [0], [0], [1], [0, 0, 1, 1], [], []>} : vector<16x16xf32>, vector<16x32xf32>, vector<16x32xf32> -> vector<16x32xf32>
    %303 = vector.broadcast %6 : vector<1x32xf32> to vector<16x32xf32>
    %304 = arith.addf %302, %303 : vector<16x32xf32>
    %305 = vector.extract_strided_slice %304 {offsets = [0, 0], sizes = [16, 16], strides = [1, 1]} : vector<16x32xf32> to vector<16x16xf32>
    %306 = vector.extract_strided_slice %304 {offsets = [0, 16], sizes = [16, 1], strides = [1, 1]} : vector<16x32xf32> to vector<16x1xf32>
    %307 = math.exp %306 : vector<16x1xf32>
    %c0_62 = arith.constant 0 : index
    %c0_63 = arith.constant 0 : index
    %c0_64 = arith.constant 0 : index
    %308 = vector.load %arg2[%c0_62, %c0_63, %c0_64] : memref<1x1x128xf32, #tpu.memory_space<vmem>>, vector<1x1x128xf32>
    %309 = vector.shape_cast %308 : vector<1x1x128xf32> to vector<1x128xf32>
    %310 = vector.extract_strided_slice %309 {offsets = [0, 0], sizes = [1, 16], strides = [1, 1]} : vector<1x128xf32> to vector<1x16xf32>
    %311 = tpu.transpose %307, [1, 0] : vector<16x1xf32> -> vector<1x16xf32>
    %312 = arith.mulf %311, %310 : vector<1x16xf32>
    %313 = vector.broadcast %312 : vector<1x16xf32> to vector<16x16xf32>
    %314 = arith.addf %305, %313 : vector<16x16xf32>
    %c328 = arith.constant 328 : index
    %c0_65 = arith.constant 0 : index
    %315 = vector.load %arg3[%c328, %c0_65] : memref<368x384xf32, #tpu.memory_space<vmem>>, vector<16x16xf32>
    %cst_66 = arith.constant dense<0.000000e+00> : vector<16x16xf32>
    %316 = tpu.matmul %314, %315, %cst_66 {dimension_numbers = #tpu.dot_dimension_numbers<[1], [0], [0], [1], [0, 0, 1, 1], [], []>} : vector<16x16xf32>, vector<16x16xf32>, vector<16x16xf32> -> vector<16x16xf32>
    %317 = vector.broadcast %7 : vector<1x16xf32> to vector<16x16xf32>
    %318 = arith.addf %316, %317 : vector<16x16xf32>
    %319 = math.tanh %318 : vector<16x16xf32>
    %c344 = arith.constant 344 : index
    %c0_67 = arith.constant 0 : index
    %320 = vector.load %arg3[%c344, %c0_67] : memref<368x384xf32, #tpu.memory_space<vmem>>, vector<16x128xf32>
    %cst_68 = arith.constant dense<0.000000e+00> : vector<16x128xf32>
    %321 = tpu.matmul %319, %320, %cst_68 {dimension_numbers = #tpu.dot_dimension_numbers<[1], [0], [0], [1], [0, 0, 1, 1], [], []>} : vector<16x16xf32>, vector<16x128xf32>, vector<16x128xf32> -> vector<16x128xf32>
    %322 = vector.broadcast %8 : vector<1x128xf32> to vector<16x128xf32>
    %323 = arith.addf %321, %322 : vector<16x128xf32>
    %324 = vector.shape_cast %323 : vector<16x128xf32> to vector<1x16x128xf32>
    %c0_69 = arith.constant 0 : index
    %c0_70 = arith.constant 0 : index
    %c0_71 = arith.constant 0 : index
    %325 = vector.load %arg4[%c0_69, %c0_70, %c0_71] : memref<1x16x128xf32, #tpu.memory_space<vmem>>, vector<1x16x128xf32>
    tpu.vector_store %arg4[%c0_69, %c0_70, %c0_71], %324 {strides = array<i32>} : memref<1x16x128xf32, #tpu.memory_space<vmem>>, vector<1x16x128xf32>,
    return
  }
  func.func @transform_0(%arg0: i32) -> (i32, i32, i32) {
    %c0_i32 = arith.constant 0 : i32
    %c0_i32_0 = arith.constant 0 : i32
    %c0_i32_1 = arith.constant 0 : i32
    return %arg0, %c0_i32, %c0_i32_0 : i32, i32, i32
  }
  func.func @transform_1(%arg0: i32) -> (i32, i32, i32) {
    %c0_i32 = arith.constant 0 : i32
    %c0_i32_0 = arith.constant 0 : i32
    %c0_i32_1 = arith.constant 0 : i32
    return %arg0, %c0_i32, %c0_i32_0 : i32, i32, i32
  }
  func.func @transform_2(%arg0: i32) -> (i32, i32) {
    %c0_i32 = arith.constant 0 : i32
    %c0_i32_0 = arith.constant 0 : i32
    %c0_i32_1 = arith.constant 0 : i32
    return %c0_i32, %c0_i32_0 : i32, i32
  }
  func.func @transform_3(%arg0: i32) -> (i32, i32, i32) {
    %c0_i32 = arith.constant 0 : i32
    %c0_i32_0 = arith.constant 0 : i32
    %c0_i32_1 = arith.constant 0 : i32
    return %arg0, %c0_i32, %c0_i32_0 : i32, i32, i32
  }
}

</mosaic_0001>

<bundles_post_ra>
// kernel: svae_forward.1
= control target key start
LH: loop header
LB: loop body
LE: loop exit
PB: predicated region body
PF: predicated region fallthrough
CT: control target
= control target key end

     0   :  { %8 = vsyncpa [#allocation4], 0  ;;  %s3997_s12 = smov 0   ;;  %s4580_s0 = inlined_call_operand.vmem [shape: s32[4,16,1], index: 0, kind: input, shape index: {}]   ;;  %s4581_s1 = inlined_call_operand.vmem [shape: f32[4,1,128], index: 1, kind: input, shape index: {}]   ;;  %s4582_s2 = inlined_call_operand.hbm [shape: f32[368,384], index: 2, kind: input, shape index: {}]   ;;  %s4583_s3 = inlined_call_operand.vmem [shape: f32[4,16,128], index: 3, kind: output, shape index: {}]  }
   0x1 LB: > { %s4003_s13 = sadd.s32 4294967295, %s3967_s12   ;;  %p2628_p0 = scmp.ge.s32.totalorder %s3967_s12, 1  ;;  %s3967_s12 = sphi %s3997_s12, %s14_s12  }
   0x2   : > { %p118_p1 = scmp.lt.s32.totalorder %s3967_s12, 5  ;;  %s3969_s14 = smov [#allocation3]  }
   0x3   : > { %s130_s15 = sshll.u32 %s3969_s14, 4  ;;  %p4584_p3 = scmp.eq.s32.totalorder %s4003_s13, 0  ;;  %s131_s15 = int_to_ptr.vmem [resolvable:$true] %s130_s15 }
   0x4   : > { %p4007_p2 = pnand %p2628_p0, %p118_p1  ;;  %s3929_s20 = scalar_lea.hbm %s4582_s2, 17664 }
   0x5   : > { %p3930_p6 = scmp.ne.s32.totalorder %s4582_s2, %s3929_s20  ;;  %p3936_p10 = scmp.lt.u32.totalorder %s3929_s20, %s4582_s2 }
   0x6   : > { %s4586_s16 = scalar_select %p4007_p2, 1, 0 }
   0x7   : > { %p3733_p4 = pneg %p4007_p2 }
   0x9   : > { %p4016_p5 = pnand %p4584_p3, %p3733_p4 }
   0xb   : > { %p3931_p7 = pneg %p4016_p5 }
   0xd   : > { %p3932_p8 = pnand %p3931_p7, %p3930_p6 }
   0xf   : > { %p3933_p9 = pneg %p3932_p8 }
  0x11   : > { %p3938_p11 = pnand %p3936_p10, %p3933_p9 }
  0x13   : > { %3941 = shalt.err (!%p3938_p11)
}
  0x14   : > { %s3942_s25 = scalar_lea.vmem %s131_s15, 17664  ;;  %p3950_p1 = scmp.lt.s32.totalorder %s131_s15, %s131_s15 }
  0x15   : > { %p3943_p12 = scmp.ne.s32.totalorder %s131_s15, %s3942_s25  ;;  %p3951_p4 = scmp.lt.s32.totalorder %s3942_s25, %s3942_s25 }
  0x17   : > { %p3945_p13 = pnand %p3943_p12, %p3931_p7  ;;  %p3952_p3 = por %p3951_p4, %p3950_p1 }
  0x19   : > { %p3946_p0 = pneg %p3945_p13 }
  0x1b   : > { %p3953_p2 = pnand %p3952_p3, %p3946_p0 }
  0x1d   : > { %3956 = shalt.err (!%p3953_p2)
}
  0x1e   : > { %s3970_s26 = smov 384   ;;  %s3971_s27 = smov 24  }
  0x1f   : > { %3736 = dma.hbm_to_vmem [thread:$0]  (!%p4016_p5), %s4582_s2, 17664, %s131_s15, [#allocation4], %s3970_s26, %s3970_s26, %s3971_s27  }
  0x20   : > { %p4588_p6 = scmp.ne.s32.totalorder %s4586_s16, 0 }
  0x21   : > { %p4589_p8 = scmp.eq.s32.totalorder (!%p4588_p6), %s4003_s13, 0 }
  0x22   : > { %160 = sbr.rel (%p4588_p6) target bundleno = 3470 (0xd8e), region = 32 }
  0x29   : > { %3962 = dma.done.wait (%p4589_p8), [#allocation4], 17664   ;;  %p4590_p7 = pmov %p4589_p8 }
  0x2a   : > { %p187_p2 = scmp.lt.s32.totalorder %s4003_s13, 3  ;;  %v3972_v0 = vmov 0   ;;  %v3973_v1 = vmov 0.0   ;;  %v416_v4 = vld [vmem:[#allocation3 + $0xb0] sm:$0xff]  ;;  %v419_v5 = vld [vmem:[#allocation3 + $0xc8] sm:$0xff]  ;;  %v418_v7 = vld [vmem:[#allocation3 + $0xc0] sm:$0xff] }
  0x2b   : > { %3964 = vsyncadd (%p4590_p7), [#allocation4], 4294949632  ;;  %3755 = vset.pattern.permute.xlu0 %v3972_v0  ;;  %327 = vmatprep.mubr.f32.mxu1 %v3973_v1  ;;  %v415_v6 = vld [vmem:[#allocation3 + $0xa8] sm:$0xff]  ;;  %v4054_v8 = vpack.c.bf16 %v419_v5, %v416_v4  ;;  %v422_v10 = vld [vmem:[#allocation3 + $0xe0] sm:$0xff]  ;;  %vm256_vm0 = vcmask 457728   ;;  %vm3975_vm3 = vmmov 0  }
  0x2c   : > { %s4592_s13 = smov (!%p187_p2, %s4003_s13), 3  ;;  %527 = vmatprep.mubr.f32.mxu0 %v3973_v1  ;;  %v4056_v9 = vpack.c.bf16 %v418_v7, %v415_v6  ;;  %v425_v11 = vld [vmem:[#allocation3 + $0xf8] sm:$0xff]  ;;  %v424_v14 = vld [vmem:[#allocation3 + $0xf0] sm:$0xff]  ;;  %v431_v16 = vld [vmem:[#allocation3 + $0x128] sm:$0xff]  ;;  %vm664_vm4 = vcmask 1041409   ;;  %vm2238_vm5 = vcmask 130048  }
  0x2d   : > { %s2683_s30 = sshll.u32 %s4592_s13, 4  ;;  %v421_v12 = vld [vmem:[#allocation3 + $0xd8] sm:$0xff]  ;;  %v4058_v13 = vpack.c.bf16 %v425_v11, %v422_v10  ;;  %v428_v15 = vld [vmem:[#allocation3 + $0x110] sm:$0xff]  ;;  %3238 = vmatprep.subr.bf16.mxu0 %v4054_v8  ;;  %v427_v18 = vld [vmem:[#allocation3 + $0x108] sm:$0xff]  ;;  %s3976_s7 = smov 112  }
  0x2e   : > { %s191_s6 = scalar_lea.vmem %s4580_s0, %s2683_s30  ;;  %3240 = vmatpush1.bf16.msra.mxu0 %v4056_v9  ;;  %v4062_v17 = vpack.c.bf16 %v424_v14, %v421_v12  ;;  %v430_v19 = vld [vmem:[#allocation3 + $0x120] sm:$0xff]  ;;  %v4065_v20 = vpack.c.bf16 %v431_v16, %v428_v15  ;;  %v224_v21 = vld [vmem:[#allocation3 + $0x8] sm:$0xff]  ;;  %v437_v25 = vld [vmem:[#allocation3 + $0x158] sm:$0xff]  ;;  %v203_v15 = vlaneseq  ;;  %s194_s10 = scalar_lea.vmem %s4581_s1, %s4592_s13 }
  0x2f   : > { %v207_v2 = vld [vmem:[%s191_s6] sm:$0xff]  ;;  %v208_v3 = vld [vmem:[%s191_s6 + $0x8] sm:$0xff]  ;;  %3242 = vmatprep.subr.bf16.mxu0 %v4058_v13  ;;  %v227_v22 = vld [vmem:[#allocation3 + $0x20] sm:$0xff]  ;;  %v4068_v30 = vpack.c.bf16 %v430_v19, %v427_v18  ;;  %s199_s15 = scalar_lea.vmem %s4583_s3, %s2683_s30 }
  0x30   : > { %212 = vperm.xlu0 %3755, %v207_v2   ;;  %v223_v23 = vld [vmem:[#allocation3] sm:$0xff]  ;;  %v3213_v26 = vpack.c.bf16 %v227_v22, %v224_v21  ;;  %v226_v27 = vld [vmem:[#allocation3 + $0x18] sm:$0xff]  ;;  %v233_v31 = vld [vmem:[#allocation3 + $0x50] sm:$0xff]  ;;  %v210_v16 = vand.u32 127, %v203_v15 }
  0x31   : > { %v434_v24 = vld [vmem:[#allocation3 + $0x140] sm:$0xff]  ;;  %v3215_v28 = vpack.c.bf16 %v226_v27, %v223_v23  ;;  %v230_v29 = vld [vmem:[#allocation3 + $0x38] sm:$0xff]  ;;  %v229_v32 = vld [vmem:[#allocation3 + $0x30] sm:$0xff] }
  0x32   : > { %3244 = vmatpush1.bf16.msra.mxu0 %v4062_v17  ;;  %3214 = vmatprep.subr.bf16.mxu1 %v3213_v26  ;;  %v232_v33 = vld [vmem:[#allocation3 + $0x48] sm:$0xff]  ;;  %v4071_v34 = vpack.c.bf16 %v437_v25, %v434_v24  ;;  %v433_v35 = vld [vmem:[#allocation3 + $0x138] sm:$0xff]  ;;  %v436_v36 = vld [vmem:[#allocation3 + $0x150] sm:$0xff]  ;;  %v3217_v38 = vpack.c.bf16 %v233_v31, %v230_v29 }
  0x33   : > { %3246 = vmatprep.subr.bf16.mxu0 %v4065_v20  ;;  %3216 = vmatpush1.bf16.msra.mxu1 %v3215_v28  ;;  %v440_v37 = vld [vmem:[#allocation3 + $0x170] sm:$0xff]  ;;  %v3219_v39 = vpack.c.bf16 %v232_v33, %v229_v32  ;;  %v443_v40 = vld [vmem:[#allocation3 + $0x188] sm:$0xff]  ;;  %v239_v42 = vld [vmem:[#allocation3 + $0x80] sm:$0xff]  ;;  %v4074_v46 = vpack.c.bf16 %v436_v36, %v433_v35 }
  0x34   : > { %215 = vperm.xlu0 %3755, %v208_v3   ;;  %v236_v41 = vld [vmem:[#allocation3 + $0x68] sm:$0xff]  ;;  %3218 = vmatprep.subr.bf16.mxu1 %v3217_v38  ;;  %v235_v44 = vld [vmem:[#allocation3 + $0x60] sm:$0xff]  ;;  %v238_v45 = vld [vmem:[#allocation3 + $0x78] sm:$0xff]  ;;  %v4077_v47 = vpack.c.bf16 %v443_v40, %v440_v37  ;;  %v3974_v37 = vmov 0.0|0.0  }
  0x35   : > { %v3221_v43 = vpack.c.bf16 %v239_v42, %v236_v41  ;;  %v439_v48 = vld [vmem:[#allocation3 + $0x168] sm:$0xff]  ;;  %v442_v49 = vld [vmem:[#allocation3 + $0x180] sm:$0xff]  ;;  %v3223_v50 = vpack.c.bf16 %v238_v45, %v235_v44  ;;  %v449_v52 = vld [vmem:[#allocation3 + $0x1b8] sm:$0xff] }
  0x36   : > { %3248 = vmatpush1.bf16.msra.mxu0 %v4068_v30  ;;  %v446_v51 = vld [vmem:[#allocation3 + $0x1a0] sm:$0xff]  ;;  %v242_v53 = vld [vmem:[#allocation3 + $0x98] sm:$0xff]  ;;  %v225_v54 = vld [vmem:[#allocation3 + $0x10] sm:$0xff]  ;;  %v4080_v56 = vpack.c.bf16 %v442_v49, %v439_v48 }
  0x37   : > { %3250 = vmatprep.subr.bf16.mxu0 %v4071_v34  ;;  %3220 = vmatpush1.bf16.msra.mxu1 %v3219_v39  ;;  %v228_v55 = vld [vmem:[#allocation3 + $0x28] sm:$0xff]  ;;  %v4083_v57 = vpack.c.bf16 %v449_v52, %v446_v51  ;;  %v445_v58 = vld [vmem:[#allocation3 + $0x198] sm:$0xff]  ;;  %v448_v59 = vld [vmem:[#allocation3 + $0x1b0] sm:$0xff] }
  0x38   : > { %3222 = vmatprep.subr.bf16.mxu1 %v3221_v43  ;;  %v452_v60 = vld [vmem:[#allocation3 + $0x1d0] sm:$0xff]  ;;  %v455_v61 = vld [vmem:[#allocation3 + $0x1e8] sm:$0xff]  ;;  %v3225_v63 = vpack.c.bf16 %v228_v55, %v225_v54  ;;  %v4086_v0 = vpack.c.bf16 %v448_v59, %v445_v58  ;;  %v454_v4 = vld [vmem:[#allocation3 + $0x1e0] sm:$0xff] }
  0x39   : > { %v241_v62 = vld [vmem:[#allocation3 + $0x90] sm:$0xff]  ;;  %v4089_v2 = vpack.c.bf16 %v455_v61, %v452_v60  ;;  %v451_v3 = vld [vmem:[#allocation3 + $0x1c8] sm:$0xff]  ;;  %v458_v5 = vld [vmem:[#allocation3 + $0x200] sm:$0xff] }
  0x3a   : > { %3252 = vmatpush1.bf16.msra.mxu0 %v4074_v46  ;;  %v461_v6 = vld [vmem:[#allocation3 + $0x218] sm:$0xff]  ;;  %v4092_v7 = vpack.c.bf16 %v454_v4, %v451_v3  ;;  %v460_v12 = vld [vmem:[#allocation3 + $0x210] sm:$0xff]  ;;  %v231_v18 = vld [vmem:[#allocation3 + $0x40] sm:$0xff] }
  0x3b   : > { %3254 = vmatprep.subr.bf16.mxu0 %v4077_v47  ;;  %3224 = vmatpush1.bf16.msra.mxu1 %v3223_v50  ;;  %v4095_v10 = vpack.c.bf16 %v461_v6, %v458_v5  ;;  %v457_v11 = vld [vmem:[#allocation3 + $0x1f8] sm:$0xff]  ;;  %v237_v24 = vld [vmem:[#allocation3 + $0x70] sm:$0xff]  ;;  %v240_v25 = vld [vmem:[#allocation3 + $0x88] sm:$0xff] }
  0x3c   : > { %275 = vmatprep.subr.mxu1 %v242_v53  ;;  %v4098_v14 = vpack.c.bf16 %v460_v12, %v457_v11  ;;  %v234_v19 = vld [vmem:[#allocation3 + $0x58] sm:$0xff]  ;;  %v3233_v27 = vpack.c.bf16 %v240_v25, %v237_v24  ;;  %v243_v29 = vld [vmem:[#allocation3 + $0xa0] sm:$0xff]  ;;  %v420_v32 = vld [vmem:[#allocation3 + $0xd0] sm:$0xff] }
  0x3d   : > { %v3229_v22 = vpack.c.bf16 %v234_v19, %v231_v18  ;;  %v417_v31 = vld [vmem:[#allocation3 + $0xb8] sm:$0xff]  ;;  %v423_v35 = vld [vmem:[#allocation3 + $0xe8] sm:$0xff]  ;;  %v426_v36 = vld [vmem:[#allocation3 + $0x100] sm:$0xff] }
  0x3e   : > { %3256 = vmatpush1.bf16.msra.mxu0 %v4080_v56  ;;  %v4128_v33 = vpack.c.bf16 %v420_v32, %v417_v31  ;;  %v4133_v38 = vpack.c.bf16 %v426_v36, %v423_v35  ;;  %v429_v39 = vld [vmem:[#allocation3 + $0x118] sm:$0xff]  ;;  %v432_v40 = vld [vmem:[#allocation3 + $0x130] sm:$0xff]  ;;  %v435_v42 = vld [vmem:[#allocation3 + $0x148] sm:$0xff] }
  0x3f   : > { %3258 = vmatprep.subr.bf16.mxu0 %v4083_v57  ;;  %276 = vmatpush1.msra.mxu1 %v241_v62  ;;  %v4139_v41 = vpack.c.bf16 %v432_v40, %v429_v39  ;;  %v438_v43 = vld [vmem:[#allocation3 + $0x160] sm:$0xff]  ;;  %v441_v45 = vld [vmem:[#allocation3 + $0x178] sm:$0xff]  ;;  %v444_v48 = vld [vmem:[#allocation3 + $0x190] sm:$0xff] }
  0x40   : > { %3226 = vmatprep.subr.bf16.mxu1 %v3225_v63  ;;  %v4143_v44 = vpack.c.bf16 %v438_v43, %v435_v42  ;;  %v4147_v49 = vpack.c.bf16 %v444_v48, %v441_v45  ;;  %v447_v50 = vld [vmem:[#allocation3 + $0x1a8] sm:$0xff]  ;;  %v450_v51 = vld [vmem:[#allocation3 + $0x1c0] sm:$0xff]  ;;  %v453_v53 = vld [vmem:[#allocation3 + $0x1d8] sm:$0xff] }
  0x41   : > { %v4151_v52 = vpack.c.bf16 %v450_v51, %v447_v50  ;;  %v456_v54 = vld [vmem:[#allocation3 + $0x1f0] sm:$0xff]  ;;  %v459_v58 = vld [vmem:[#allocation3 + $0x208] sm:$0xff]  ;;  %v462_v59 = vld [vmem:[#allocation3 + $0x220] sm:$0xff] }
  0x42   : > { %3260 = vmatpush1.bf16.msra.mxu0 %v4086_v0  ;;  %v4155_v55 = vpack.c.bf16 %v456_v54, %v453_v53  ;;  %v4159_v60 = vpack.c.bf16 %v462_v59, %v459_v58  ;;  %v200_v6 = vld [vmem:[#allocation3 + $0x438] sm:$0xff]  ;;  %v202_v53 = vld [vmem:[#allocation3 + $0x448] sm:$0xff] }
  0x43   : > { %3262 = vmatprep.subr.bf16.mxu0 %v4089_v2 }
  0x46   : > { %3264 = vmatpush1.bf16.msra.mxu0 %v4092_v7 }
  0x47   : > { %3266 = vmatprep.subr.bf16.mxu0 %v4095_v10 }
  0x4a   : > { %3268 = vmatpush1.bf16.msra.mxu0 %v4098_v14 }
  0x4b   : > { %3294 = vmatprep.subr.bf16.mxu0 %v4054_v8 }
  0x4d   : > { %528 = vmatmul.mubr.f32.vlgmr.msra.gmra.mrb[0].mxu0 %v3973_v1 }
  0x4e   : > { %3296 = vmatpush1.bf16.msra.mxu0 %v4056_v9  ;;  %731 = vmatprep.mubr.f32.mxu0 %v3973_v1 }
  0x4f   : > { %3298 = vmatprep.subr.bf16.mxu0 %v4058_v13 }
  0x52   : > { %3300 = vmatpush1.bf16.msra.mxu0 %v4062_v17 }
  0x53   : > { %3302 = vmatprep.subr.bf16.mxu0 %v4065_v20 }
  0x56   : > { %3304 = vmatpush1.bf16.msra.mxu0 %v4068_v30 }
  0x57   : > { %3306 = vmatprep.subr.bf16.mxu0 %v4071_v34 }
  0x5a   : > { %3308 = vmatpush1.bf16.msra.mxu0 %v4074_v46 }
  0x5b   : > { %3310 = vmatprep.subr.bf16.mxu0 %v4077_v47 }
  0x5e   : > { %3312 = vmatpush1.bf16.msra.mxu0 %v4080_v56 }
  0x5f   : > { %3314 = vmatprep.subr.bf16.mxu0 %v4083_v57 }
  0x62   : > { %3316 = vmatpush1.bf16.msra.mxu0 %v4086_v0 }
  0x63   : > { %3318 = vmatprep.subr.bf16.mxu0 %v4089_v2 }
  0x66   : > { %3320 = vmatpush1.bf16.msra.mxu0 %v4092_v7 }
  0x67   : > { %3322 = vmatprep.subr.bf16.mxu0 %v4095_v10 }
  0x6a   : > { %3324 = vmatpush1.bf16.msra.mxu0 %v4098_v14 }
  0x6b   : > { %3350 = vmatprep.subr.bf16.mxu0 %v4054_v8 }
  0xaf   : > { %v213_v21 = vpop.permute.xlu0 %212 }
  0xb0   : > { %vm217_vm1 = vcmp.eq.s32.totalorder %v210_v16, %v213_v21 }
  0xb1   : > { %v2637_v23 = vsel %vm217_vm1, 1.0, %v3973_v1 }
  0xb2   : > { %2639 = vmatmul.mubr.msk.f32.vlgmr.msra.gmra.mrb[0].mxu1 %vm256_vm0, %v2637_v23 }
  0xb3   : > { %3228 = vmatpush3.bf16.msra.mxu1 %v3225_v63  ;;  %v216_v26 = vpop.permute.xlu0 %215  ;;  %333 = vmatprep.mubr.f32.mxu1 %v3973_v1  ;;  %v4184_v63 = vshrl.u32 %v203_v15, 7 }
  0xb4   : > { %vm218_vm2 = vcmp.eq.s32.totalorder %v210_v16, %v216_v26  ;;  %3230 = vmatprep.subr.bf16.mxu1 %v3229_v22 }
  0xb5   : > { %v2638_v28 = vsel %vm218_vm2, 1.0, %v3973_v1  ;;  %v4187_v4 = vsub.s32 0, %v4184_v63  ;;  %v205_v50 = vsub.s32 1, %v4184_v63 }
  0xb6   : > { %2640 = vmatmul.mubr.msk.f32.gmra.mrb[2].mxu1 %vm256_vm0, %v2638_v28 }
  0xb7   : > { %3232 = vmatpush3.bf16.msra.mxu1 %v3229_v22  ;;  %2874 = vmatprep.mubr.msk.f32.mxu1 %vm256_vm0, %v2637_v23  ;;  %v247_v12 = vrot.slane %v200_v6, %v4187_v4  ;;  %v201_v22 = vld [vmem:[#allocation3 + $0x440] sm:$0xff]  ;;  %v4204_v54 = vrot.slane %v200_v6, %v205_v50 }
  0xb8   : > { %3234 = vmatprep.subr.bf16.mxu1 %v3233_v27  ;;  %v251_v26 = vrot.slane %v201_v22, %v4187_v4 }
  0xbb   : > { %3236 = vmatpush3.bf16.msra.mxu1 %v3233_v27 }
  0xbc   : > { %2872 = vmatprep.subr.mxu1 %v243_v29 }
  0xbf   : > { %2873 = vmatpush3.msra.mxu1 %v243_v29 }
  0xc0   : > { %2875 = vmatmul.mubr.msk.f32.vlgmr.msra.gmra.mrb[4].mxu1 %vm256_vm0, %v2638_v28  ;;  %3269 = vmatprep.subr.bf16.mxu1 %v3974_v37 }
  0xc1   : > { %3271 = vmatpush3.bf16.msra.mxu1 %v4128_v33  ;;  %2909 = vmatprep.mubr.msk.f32.mxu1 %vm3975_vm3, %v3973_v1 }
  0xc2   : > { %3272 = vmatprep.subr.bf16.mxu1 %v3974_v37 }
  0xc5   : > { %3274 = vmatpush3.bf16.msra.mxu1 %v4133_v38 }
  0xc6   : > { %3275 = vmatprep.subr.bf16.mxu1 %v3974_v37 }
  0xc9   : > { %3277 = vmatpush3.bf16.msra.mxu1 %v4139_v41 }
  0xca   : > { %3278 = vmatprep.subr.bf16.mxu1 %v3974_v37 }
  0xcd   : > { %3280 = vmatpush3.bf16.msra.mxu1 %v4143_v44 }
  0xce   : > { %3281 = vmatprep.subr.bf16.mxu1 %v3974_v37 }
  0xd1   : > { %3283 = vmatpush3.bf16.msra.mxu1 %v4147_v49 }
  0xd2   : > { %3284 = vmatprep.subr.bf16.mxu1 %v3974_v37 }
  0xd5   : > { %3286 = vmatpush3.bf16.msra.mxu1 %v4151_v52 }
  0xd6   : > { %3287 = vmatprep.subr.bf16.mxu1 %v3974_v37 }
  0xd9   : > { %3289 = vmatpush3.bf16.msra.mxu1 %v4155_v55 }
  0xda   : > { %3290 = vmatprep.subr.bf16.mxu1 %v3974_v37 }
  0xdd   : > { %3292 = vmatpush3.bf16.msra.mxu1 %v4159_v60 }
  0xde   : > { %3325 = vmatprep.subr.bf16.mxu1 %v3974_v37 }
  0xe0   : > { %2910 = vmatmul.mubr.f32.vlgmr.msra.gmra.mrb[6].mxu1 %v3973_v1 }
  0xe1   : > { %3327 = vmatpush3.bf16.msra.mxu1 %v4128_v33  ;;  %2944 = vmatprep.mubr.msk.f32.mxu1 %vm3975_vm3, %v3973_v1 }
  0xe2   : > { %3328 = vmatprep.subr.bf16.mxu1 %v3974_v37 }
  0xe5   : > { %3330 = vmatpush3.bf16.msra.mxu1 %v4133_v38 }
  0xe6   : > { %3331 = vmatprep.subr.bf16.mxu1 %v3974_v37 }
  0xe9   : > { %3333 = vmatpush3.bf16.msra.mxu1 %v4139_v41 }
  0xea   : > { %3334 = vmatprep.subr.bf16.mxu1 %v3974_v37 }
  0xed   : > { %3336 = vmatpush3.bf16.msra.mxu1 %v4143_v44 }
  0xee   : > { %3337 = vmatprep.subr.bf16.mxu1 %v3974_v37 }
  0xf1   : > { %3339 = vmatpush3.bf16.msra.mxu1 %v4147_v49 }
  0xf2   : > { %3340 = vmatprep.subr.bf16.mxu1 %v3974_v37 }
  0xf5   : > { %3342 = vmatpush3.bf16.msra.mxu1 %v4151_v52 }
  0xf6   : > { %3343 = vmatprep.subr.bf16.mxu1 %v3974_v37 }
  0xf9   : > { %3345 = vmatpush3.bf16.msra.mxu1 %v4155_v55 }
  0xfa   : > { %3346 = vmatprep.subr.bf16.mxu1 %v3974_v37 }
  0xfd   : > { %3348 = vmatpush3.bf16.msra.mxu1 %v4159_v60 }
  0xfe   : > { %3381 = vmatprep.subr.bf16.mxu1 %v3974_v37 }
 0x120   : > { %v529_v61 = vpop.f32.mrb[0].mxu0 }
 0x121   : > { %v531_v62 = vpop.f32.mrb[1].mxu0  ;;  %v605_v19 = vrot.slane %v529_v61, 1 }
 0x122   : > { %v623_v31 = vrot.slane %v531_v62, 1 }
 0x185   : > { %v329_v3 = vpop.f32.mrb[0].mxu1 }
 0x186   : > { %v331_v5 = vpop.f32.mrb[1].mxu1  ;;  %v4190_v18 = vadd.f32 %v329_v3, %v247_v12 }
 0x187   : > { %v4197_v29 = vadd.f32 %v331_v5, %v251_v26 }
 0x188   : > { %v608_v23 = vadd.f32 %v529_v61, %v4190_v18  ;;  %v255_v61 = vrot.slane %v202_v53, %v4187_v4 }
 0x189   : > { %v335_v11 = vpop.f32.mrb[2].mxu1  ;;  %v626_v35 = vadd.f32 %v531_v62, %v4197_v29 }
 0x18a   : > { %v337_v16 = vpop.f32.mrb[3].mxu1  ;;  %v4192_v21 = vadd.f32 %v335_v11, %v247_v12  ;;  %v2643_v27 = vmul.f32 -1.442695, %v608_v23 }
 0x18b   : > { %v4199_v32 = vadd.f32 %v337_v16, %v251_v26  ;;  %v2645_v39 = vmul.f32 -1.442695, %v626_v35 }
 0x18c   : > { %v609_v25 = vadd.f32 %v605_v19, %v4192_v21  ;;  %3756 = vpow2.f32 %v2643_v27 }
 0x18d   : > { %v627_v36 = vadd.f32 %v623_v31, %v4199_v32 }
 0x18e   : > { %v2644_v28 = vmul.f32 -1.442695, %v609_v25 }
 0x18f   : > { %v2646_v40 = vmul.f32 -1.442695, %v627_v36 }
 0x190   : > { %3758 = vpow2.f32 %v2644_v28 }
 0x191   : > { %3760 = vpow2.f32 %v2645_v39 }
 0x192   : > { %3762 = vpow2.f32 %v2646_v40 }
 0x193   : > { %v2876_v15 = vpop.f32.mrb[4].mxu1 }
 0x194   : > { %v406_v24 = vpop.f32.mrb[5].mxu1  ;;  %v4210_v25 = vadd.f32 %v2876_v15, %v255_v61 }
 0x195   : > { %v4208_v16 = vadd.f32 %v406_v24, %v255_v61 }
 0x196   : > { %v3757_v42 = vpop.eup %3756 }
 0x197   : > { %v616_v45 = vadd.f32 1.0, %v3757_v42 }
 0x199   : > { %3764 = vrcp.f32 %v616_v45 }
 0x19a   : > { %v3759_v43 = vpop.eup %3758 }
 0x19b   : > { %v617_v48 = vadd.f32 1.0, %v3759_v43  ;;  %v3761_v51 = vpop.eup %3760 }
 0x19c   : > { %v3763_v58 = vpop.eup %3762  ;;  %v634_v59 = vadd.f32 1.0, %v3761_v51 }
 0x19d   : > { %3766 = vrcp.f32 %v617_v48  ;;  %v635_v11 = vadd.f32 1.0, %v3763_v58 }
 0x19e   : > { %3768 = vrcp.f32 %v634_v59 }
 0x19f   : > { %3770 = vrcp.f32 %v635_v11 }
 0x1a3   : > { %v3765_v12 = vpop.eup %3764 }
 0x1a7   : > { %v3767_v23 = vpop.eup %3766 }
 0x1a8   : > { %v3769_v28 = vpop.eup %3768 }
 0x1a9   : > { %v3771_v31 = vpop.eup %3770  ;;  %v651_v35 = vsub.f32 1.0, %v3769_v28  ;;  %v655_v40 = vmul.f32 0.0, %v3769_v28 }
 0x1aa   : > { %v652_v39 = vsub.f32 1.0, %v3771_v31  ;;  %v656_v45 = vmul.f32 0.0, %v3771_v31 }
 0x1b3   : > { %v600_v62 = vpop.f32.mrb[6].mxu1 }
 0x1b4   : > { %v640_v3 = vadd.f32 %v600_v62, %v4204_v54  ;;  %v2911_v5 = vpop.f32.mrb[7].mxu1 }
 0x1b6   : > { %v642_v19 = vrot.slane %v640_v3, 1  ;;  %v645_v22 = vmul.f32 %v3765_v12, %v640_v3 }
 0x1b8   : > { %v646_v6 = vmul.f32 %v3767_v23, %v642_v19  ;;  %v647_v26 = vadd.f32 %v645_v22, %v4208_v16 }
 0x1ba   : > { %v648_v27 = vadd.f32 %v646_v6, %v4210_v25  ;;  %3772 = vtanh.f32 %v647_v26 }
 0x1bc   : > { %3774 = vtanh.f32 %v648_v27 }
 0x1c4   : > { %v3773_v36 = vpop.eup %3772 }
 0x1c5   : > { %v653_v24 = vmul.f32 %v3773_v36, %v651_v35 }
 0x1c6   : > { %v3775_v42 = vpop.eup %3774 }
 0x1c7   : > { %v654_v43 = vmul.f32 %v3775_v42, %v652_v39  ;;  %v4214_v15 = vadd.f32 %v655_v40, %v653_v24 }
 0x1c9   : > { %v4216_v48 = vadd.f32 %v656_v45, %v654_v43  ;;  %659 = vst [vmem:[#allocation2] sm:$0x1] %v4214_v15 }
 0x1cb   : > { %660 = vst [vmem:[#allocation2 + $0x8] sm:$0x1] %v4216_v48  ;;  %v663_v50 = vrot.slane %v4216_v48, 7 }
 0x1cd   : > { %v665_v51 = vsel %vm664_vm4, %v663_v50, %v4214_v15 }
 0x1ce   : > { %732 = vmatmul.mubr.f32.vlgmr.msra.gmra.mrb[2].mxu0 %v665_v51  ;;  %2945 = vmatmul.mubr.f32.vlgmr.msra.gmra.mrb[8].mxu1 %v665_v51 }
 0x1cf   : > { %3352 = vmatpush1.bf16.msra.mxu0 %v4056_v9  ;;  %3383 = vmatpush3.bf16.msra.mxu1 %v4128_v33 }
 0x1d0   : > { %3354 = vmatprep.subr.bf16.mxu0 %v4058_v13  ;;  %3384 = vmatprep.subr.bf16.mxu1 %v3974_v37 }
 0x1d1   : > { %937 = vmatprep.mubr.f32.mxu0 %v3973_v1  ;;  %2979 = vmatprep.mubr.msk.f32.mxu1 %vm3975_vm3, %v3973_v1 }
 0x1d3   : > { %3356 = vmatpush1.bf16.msra.mxu0 %v4062_v17  ;;  %3386 = vmatpush3.bf16.msra.mxu1 %v4133_v38 }
 0x1d4   : > { %3358 = vmatprep.subr.bf16.mxu0 %v4065_v20  ;;  %3387 = vmatprep.subr.bf16.mxu1 %v3974_v37 }
 0x1d7   : > { %3360 = vmatpush1.bf16.msra.mxu0 %v4068_v30  ;;  %3389 = vmatpush3.bf16.msra.mxu1 %v4139_v41 }
 0x1d8   : > { %3362 = vmatprep.subr.bf16.mxu0 %v4071_v34  ;;  %3390 = vmatprep.subr.bf16.mxu1 %v3974_v37 }
 0x1db   : > { %3364 = vmatpush1.bf16.msra.mxu0 %v4074_v46  ;;  %3392 = vmatpush3.bf16.msra.mxu1 %v4143_v44 }
 0x1dc   : > { %3366 = vmatprep.subr.bf16.mxu0 %v4077_v47  ;;  %3393 = vmatprep.subr.bf16.mxu1 %v3974_v37 }
 0x1df   : > { %3368 = vmatpush1.bf16.msra.mxu0 %v4080_v56  ;;  %3395 = vmatpush3.bf16.msra.mxu1 %v4147_v49 }
 0x1e0   : > { %3370 = vmatprep.subr.bf16.mxu0 %v4083_v57  ;;  %3396 = vmatprep.subr.bf16.mxu1 %v3974_v37 }
 0x1e3   : > { %3372 = vmatpush1.bf16.msra.mxu0 %v4086_v0  ;;  %3398 = vmatpush3.bf16.msra.mxu1 %v4151_v52 }
 0x1e4   : > { %3374 = vmatprep.subr.bf16.mxu0 %v4089_v2  ;;  %3399 = vmatprep.subr.bf16.mxu1 %v3974_v37 }
 0x1e7   : > { %3376 = vmatpush1.bf16.msra.mxu0 %v4092_v7  ;;  %3401 = vmatpush3.bf16.msra.mxu1 %v4155_v55 }
 0x1e8   : > { %3378 = vmatprep.subr.bf16.mxu0 %v4095_v10  ;;  %3402 = vmatprep.subr.bf16.mxu1 %v3974_v37 }
 0x1eb   : > { %3380 = vmatpush1.bf16.msra.mxu0 %v4098_v14  ;;  %3404 = vmatpush3.bf16.msra.mxu1 %v4159_v60 }
 0x1ec   : > { %3406 = vmatprep.subr.bf16.mxu0 %v4054_v8  ;;  %3437 = vmatprep.subr.bf16.mxu1 %v3974_v37 }
 0x2a1   : > { %v733_v53 = vpop.f32.mrb[2].mxu0  ;;  %v804_v58 = vpop.f32.mrb[8].mxu1 }
 0x2a2   : > { %v809_v59 = vrot.slane %v733_v53, 7  ;;  %v813_v61 = vadd.f32 %v733_v53, %v4192_v21  ;;  %v735_v62 = vpop.f32.mrb[3].mxu0  ;;  %v2946_v3 = vpop.f32.mrb[9].mxu1  ;;  %v844_v40 = vadd.f32 %v804_v58, %v4204_v54 }
 0x2a3   : > { %v827_v5 = vrot.slane %v735_v62, 7  ;;  %v831_v22 = vadd.f32 %v735_v62, %v4199_v32 }
 0x2a4   : > { %v812_v11 = vadd.f32 %v809_v59, %v4190_v18  ;;  %v2648_v12 = vmul.f32 -1.442695, %v813_v61  ;;  %v846_v45 = vrot.slane %v844_v40, 7  ;;  %v859_v59 = vrot.slane %v4214_v15, 7 }
 0x2a5   : > { %v830_v19 = vadd.f32 %v827_v5, %v4197_v29  ;;  %v2650_v26 = vmul.f32 -1.442695, %v831_v22 }
 0x2a6   : > { %v2647_v23 = vmul.f32 -1.442695, %v812_v11  ;;  %3776 = vpow2.f32 %v2648_v12 }
 0x2a7   : > { %v2649_v6 = vmul.f32 -1.442695, %v830_v19 }
 0x2a8   : > { %3778 = vpow2.f32 %v2647_v23 }
 0x2a9   : > { %3780 = vpow2.f32 %v2649_v6 }
 0x2aa   : > { %3782 = vpow2.f32 %v2650_v26 }
 0x2b0   : > { %v3777_v27 = vpop.eup %3776 }
 0x2b1   : > { %v821_v28 = vadd.f32 1.0, %v3777_v27 }
 0x2b2   : > { %v3779_v31 = vpop.eup %3778 }
 0x2b3   : > { %v3781_v35 = vpop.eup %3780  ;;  %v820_v36 = vadd.f32 1.0, %v3779_v31  ;;  %3784 = vrcp.f32 %v821_v28 }
 0x2b4   : > { %v838_v39 = vadd.f32 1.0, %v3781_v35  ;;  %v3783_v24 = vpop.eup %3782 }
 0x2b5   : > { %3786 = vrcp.f32 %v820_v36  ;;  %v839_v42 = vadd.f32 1.0, %v3783_v24 }
 0x2b6   : > { %3788 = vrcp.f32 %v838_v39 }
 0x2b7   : > { %3790 = vrcp.f32 %v839_v42 }
 0x2bd   : > { %v3785_v43 = vpop.eup %3784 }
 0x2be   : > { %v850_v51 = vmul.f32 %v3785_v43, %v844_v40 }
 0x2bf   : > { %v3787_v53 = vpop.eup %3786 }
 0x2c0   : > { %v3789_v61 = vpop.eup %3788  ;;  %v849_v62 = vmul.f32 %v3787_v53, %v846_v45  ;;  %v852_v3 = vadd.f32 %v850_v51, %v4210_v25 }
 0x2c1   : > { %v862_v5 = vmul.f32 %v3789_v61, %v859_v59  ;;  %v3791_v12 = vpop.eup %3790  ;;  %v855_v22 = vsub.f32 1.0, %v3789_v61 }
 0x2c2   : > { %v851_v11 = vadd.f32 %v849_v62, %v4208_v16  ;;  %3792 = vtanh.f32 %v852_v3  ;;  %v856_v19 = vsub.f32 1.0, %v3791_v12  ;;  %v863_v6 = vmul.f32 %v3791_v12, %v663_v50 }
 0x2c4   : > { %3794 = vtanh.f32 %v851_v11 }
 0x2cc   : > { %v3793_v58 = vpop.eup %3792 }
 0x2cd   : > { %v858_v23 = vmul.f32 %v3793_v58, %v856_v19 }
 0x2ce   : > { %v3795_v26 = vpop.eup %3794 }
 0x2cf   : > { %v857_v27 = vmul.f32 %v3795_v26, %v855_v22  ;;  %v4270_v15 = vadd.f32 %v863_v6, %v858_v23 }
 0x2d1   : > { %v4272_v28 = vadd.f32 %v862_v5, %v857_v27  ;;  %867 = vst [vmem:[#allocation2 + $0x8] sm:$0x2] %v4270_v15 }
 0x2d3   : > { %866 = vst [vmem:[#allocation2] sm:$0x2] %v4272_v28  ;;  %v870_v31 = vrot.slane %v4272_v28, 1 }
 0x2d5   : > { %v871_v35 = vsel %vm664_vm4, %v4270_v15, %v870_v31 }
 0x2d6   : > { %938 = vmatmul.mubr.f32.vlgmr.msra.gmra.mrb[4].mxu0 %v871_v35  ;;  %2980 = vmatmul.mubr.f32.vlgmr.msra.gmra.mrb[10].mxu1 %v871_v35 }
 0x2d7   : > { %3408 = vmatpush1.bf16.msra.mxu0 %v4056_v9  ;;  %3439 = vmatpush3.bf16.msra.mxu1 %v4128_v33 }
 0x2d8   : > { %3410 = vmatprep.subr.bf16.mxu0 %v4058_v13  ;;  %3440 = vmatprep.subr.bf16.mxu1 %v3974_v37 }
 0x2d9   : > { %1148 = vmatprep.mubr.f32.mxu0 %v3973_v1  ;;  %3014 = vmatprep.mubr.msk.f32.mxu1 %vm3975_vm3, %v3973_v1 }
 0x2db   : > { %3412 = vmatpush1.bf16.msra.mxu0 %v4062_v17  ;;  %3442 = vmatpush3.bf16.msra.mxu1 %v4133_v38 }
 0x2dc   : > { %3414 = vmatprep.subr.bf16.mxu0 %v4065_v20  ;;  %3443 = vmatprep.subr.bf16.mxu1 %v3974_v37 }
 0x2df   : > { %3416 = vmatpush1.bf16.msra.mxu0 %v4068_v30  ;;  %3445 = vmatpush3.bf16.msra.mxu1 %v4139_v41 }
 0x2e0   : > { %3418 = vmatprep.subr.bf16.mxu0 %v4071_v34  ;;  %3446 = vmatprep.subr.bf16.mxu1 %v3974_v37 }
 0x2e3   : > { %3420 = vmatpush1.bf16.msra.mxu0 %v4074_v46  ;;  %3448 = vmatpush3.bf16.msra.mxu1 %v4143_v44 }
 0x2e4   : > { %3422 = vmatprep.subr.bf16.mxu0 %v4077_v47  ;;  %3449 = vmatprep.subr.bf16.mxu1 %v3974_v37 }
 0x2e7   : > { %3424 = vmatpush1.bf16.msra.mxu0 %v4080_v56  ;;  %3451 = vmatpush3.bf16.msra.mxu1 %v4147_v49 }
 0x2e8   : > { %3426 = vmatprep.subr.bf16.mxu0 %v4083_v57  ;;  %3452 = vmatprep.subr.bf16.mxu1 %v3974_v37 }
 0x2eb   : > { %3428 = vmatpush1.bf16.msra.mxu0 %v4086_v0  ;;  %3454 = vmatpush3.bf16.msra.mxu1 %v4151_v52 }
 0x2ec   : > { %3430 = vmatprep.subr.bf16.mxu0 %v4089_v2  ;;  %3455 = vmatprep.subr.bf16.mxu1 %v3974_v37 }
 0x2ef   : > { %3432 = vmatpush1.bf16.msra.mxu0 %v4092_v7  ;;  %3457 = vmatpush3.bf16.msra.mxu1 %v4155_v55 }
 0x2f0   : > { %3434 = vmatprep.subr.bf16.mxu0 %v4095_v10  ;;  %3458 = vmatprep.subr.bf16.mxu1 %v3974_v37 }
 0x2f3   : > { %3436 = vmatpush1.bf16.msra.mxu0 %v4098_v14  ;;  %3460 = vmatpush3.bf16.msra.mxu1 %v4159_v60 }
 0x2f4   : > { %3462 = vmatprep.subr.bf16.mxu0 %v4054_v8  ;;  %3493 = vmatprep.subr.bf16.mxu1 %v3974_v37 }
 0x3a9   : > { %v939_v48 = vpop.f32.mrb[4].mxu0  ;;  %v1010_v50 = vpop.f32.mrb[10].mxu1 }
 0x3aa   : > { %v1015_v36 = vrot.slane %v939_v48, 6  ;;  %v1016_v39 = vrot.slane %v939_v48, 7  ;;  %v941_v24 = vpop.f32.mrb[5].mxu0  ;;  %v2981_v40 = vpop.f32.mrb[11].mxu1  ;;  %v1052_v27 = vadd.f32 %v1010_v50, %v4204_v54 }
 0x3ab   : > { %v1034_v42 = vrot.slane %v941_v24, 6  ;;  %v1035_v43 = vrot.slane %v941_v24, 7  ;;  %v1068_v24 = vrot.slane %v4272_v28, 7 }
 0x3ac   : > { %v1019_v45 = vadd.f32 %v1015_v36, %v4190_v18  ;;  %v1020_v51 = vadd.f32 %v1016_v39, %v4192_v21  ;;  %v1054_v31 = vrot.slane %v1052_v27, 6  ;;  %v1055_v48 = vrot.slane %v1052_v27, 7 }
 0x3ad   : > { %v1038_v53 = vadd.f32 %v1034_v42, %v4197_v29  ;;  %v1039_v59 = vadd.f32 %v1035_v43, %v4199_v32  ;;  %v1069_v42 = vrot.slane %v4270_v15, 7 }
 0x3ae   : > { %v2651_v61 = vmul.f32 -1.442695, %v1019_v45  ;;  %v2652_v62 = vmul.f32 -1.442695, %v1020_v51 }
 0x3af   : > { %v2653_v3 = vmul.f32 -1.442695, %v1038_v53  ;;  %v2654_v5 = vmul.f32 -1.442695, %v1039_v59 }
 0x3b0   : > { %3796 = vpow2.f32 %v2651_v61 }
 0x3b1   : > { %3798 = vpow2.f32 %v2652_v62 }
 0x3b2   : > { %3800 = vpow2.f32 %v2653_v3 }
 0x3b3   : > { %3802 = vpow2.f32 %v2654_v5 }
 0x3ba   : > { %v3797_v11 = vpop.eup %3796 }
 0x3bb   : > { %v3799_v12 = vpop.eup %3798  ;;  %v1027_v19 = vadd.f32 1.0, %v3797_v11 }
 0x3bc   : > { %v3801_v58 = vpop.eup %3800  ;;  %v1028_v22 = vadd.f32 1.0, %v3799_v12 }
 0x3bd   : > { %v3803_v23 = vpop.eup %3802  ;;  %3804 = vrcp.f32 %v1027_v19  ;;  %v1046_v6 = vadd.f32 1.0, %v3801_v58 }
 0x3be   : > { %3806 = vrcp.f32 %v1028_v22  ;;  %v1047_v26 = vadd.f32 1.0, %v3803_v23 }
 0x3bf   : > { %3808 = vrcp.f32 %v1046_v6 }
 0x3c0   : > { %3810 = vrcp.f32 %v1047_v26 }
 0x3c7   : > { %v3805_v35 = vpop.eup %3804 }
 0x3c8   : > { %v3807_v36 = vpop.eup %3806  ;;  %v1058_v39 = vmul.f32 %v3805_v35, %v1054_v31 }
 0x3c9   : > { %v3809_v40 = vpop.eup %3808  ;;  %v1059_v43 = vmul.f32 %v3807_v36, %v1055_v48 }
 0x3ca   : > { %v3811_v45 = vpop.eup %3810  ;;  %v1060_v51 = vadd.f32 %v1058_v39, %v4208_v16  ;;  %v1072_v53 = vmul.f32 %v3809_v40, %v1068_v24  ;;  %v1064_v50 = vsub.f32 1.0, %v3809_v40 }
 0x3cb   : > { %v1061_v59 = vadd.f32 %v1059_v43, %v4210_v25  ;;  %v1073_v61 = vmul.f32 %v3811_v45, %v1069_v42  ;;  %v1065_v3 = vsub.f32 1.0, %v3811_v45 }
 0x3cc   : > { %3812 = vtanh.f32 %v1060_v51 }
 0x3cd   : > { %3814 = vtanh.f32 %v1061_v59 }
 0x3d6   : > { %v3813_v62 = vpop.eup %3812 }
 0x3d7   : > { %v3815_v5 = vpop.eup %3814  ;;  %v1066_v11 = vmul.f32 %v3813_v62, %v1064_v50 }
 0x3d8   : > { %v1067_v12 = vmul.f32 %v3815_v5, %v1065_v3 }
 0x3d9   : > { %v4323_v28 = vadd.f32 %v1072_v53, %v1066_v11 }
 0x3da   : > { %v4325_v19 = vadd.f32 %v1073_v61, %v1067_v12 }
 0x3db   : > { %1076 = vst [vmem:[#allocation2] sm:$0x4] %v4323_v28  ;;  %v1080_v15 = vrot.slane %v4323_v28, 2 }
 0x3dc   : > { %1077 = vst [vmem:[#allocation2 + $0x8] sm:$0x4] %v4325_v19  ;;  %v1081_v58 = vrot.slane %v4325_v19, 1 }
 0x3de   : > { %v1082_v22 = vsel %vm664_vm4, %v1081_v58, %v1080_v15 }
 0x3df   : > { %1149 = vmatmul.mubr.f32.vlgmr.msra.gmra.mrb[6].mxu0 %v1082_v22  ;;  %3015 = vmatmul.mubr.f32.vlgmr.msra.gmra.mrb[12].mxu1 %v1082_v22 }
 0x3e0   : > { %3464 = vmatpush1.bf16.msra.mxu0 %v4056_v9  ;;  %3495 = vmatpush3.bf16.msra.mxu1 %v4128_v33 }
 0x3e1   : > { %3466 = vmatprep.subr.bf16.mxu0 %v4058_v13  ;;  %3496 = vmatprep.subr.bf16.mxu1 %v3974_v37 }
 0x3e2   : > { %1359 = vmatprep.mubr.f32.mxu0 %v3973_v1  ;;  %3049 = vmatprep.mubr.msk.f32.mxu1 %vm3975_vm3, %v3973_v1 }
 0x3e4   : > { %3468 = vmatpush1.bf16.msra.mxu0 %v4062_v17  ;;  %3498 = vmatpush3.bf16.msra.mxu1 %v4133_v38 }
 0x3e5   : > { %3470 = vmatprep.subr.bf16.mxu0 %v4065_v20  ;;  %3499 = vmatprep.subr.bf16.mxu1 %v3974_v37 }
 0x3e8   : > { %3472 = vmatpush1.bf16.msra.mxu0 %v4068_v30  ;;  %3501 = vmatpush3.bf16.msra.mxu1 %v4139_v41 }
 0x3e9   : > { %3474 = vmatprep.subr.bf16.mxu0 %v4071_v34  ;;  %3502 = vmatprep.subr.bf16.mxu1 %v3974_v37 }
 0x3ec   : > { %3476 = vmatpush1.bf16.msra.mxu0 %v4074_v46  ;;  %3504 = vmatpush3.bf16.msra.mxu1 %v4143_v44 }
 0x3ed   : > { %3478 = vmatprep.subr.bf16.mxu0 %v4077_v47  ;;  %3505 = vmatprep.subr.bf16.mxu1 %v3974_v37 }
 0x3f0   : > { %3480 = vmatpush1.bf16.msra.mxu0 %v4080_v56  ;;  %3507 = vmatpush3.bf16.msra.mxu1 %v4147_v49 }
 0x3f1   : > { %3482 = vmatprep.subr.bf16.mxu0 %v4083_v57  ;;  %3508 = vmatprep.subr.bf16.mxu1 %v3974_v37 }
 0x3f4   : > { %3484 = vmatpush1.bf16.msra.mxu0 %v4086_v0  ;;  %3510 = vmatpush3.bf16.msra.mxu1 %v4151_v52 }
 0x3f5   : > { %3486 = vmatprep.subr.bf16.mxu0 %v4089_v2  ;;  %3511 = vmatprep.subr.bf16.mxu1 %v3974_v37 }
 0x3f8   : > { %3488 = vmatpush1.bf16.msra.mxu0 %v4092_v7  ;;  %3513 = vmatpush3.bf16.msra.mxu1 %v4155_v55 }
 0x3f9   : > { %3490 = vmatprep.subr.bf16.mxu0 %v4095_v10  ;;  %3514 = vmatprep.subr.bf16.mxu1 %v3974_v37 }
 0x3fc   : > { %3492 = vmatpush1.bf16.msra.mxu0 %v4098_v14  ;;  %3516 = vmatpush3.bf16.msra.mxu1 %v4159_v60 }
 0x3fd   : > { %3518 = vmatprep.subr.bf16.mxu0 %v4054_v8  ;;  %3549 = vmatprep.subr.bf16.mxu1 %v3974_v37 }
 0x4b2   : > { %v1150_v23 = vpop.f32.mrb[6].mxu0  ;;  %v1221_v6 = vpop.f32.mrb[12].mxu1 }
 0x4b3   : > { %v1226_v26 = vrot.slane %v1150_v23, 5  ;;  %v1227_v27 = vrot.slane %v1150_v23, 6  ;;  %v1152_v31 = vpop.f32.mrb[7].mxu0  ;;  %v3016_v35 = vpop.f32.mrb[13].mxu1  ;;  %v1263_v15 = vadd.f32 %v1221_v6, %v4204_v54 }
 0x4b4   : > { %v1245_v48 = vrot.slane %v1152_v31, 5  ;;  %v1246_v36 = vrot.slane %v1152_v31, 6  ;;  %v1279_v31 = vrot.slane %v4323_v28, 7 }
 0x4b5   : > { %v1230_v39 = vadd.f32 %v1226_v26, %v4190_v18  ;;  %v1231_v24 = vadd.f32 %v1227_v27, %v4192_v21  ;;  %v1265_v58 = vrot.slane %v1263_v15, 5  ;;  %v1266_v23 = vrot.slane %v1263_v15, 6 }
 0x4b6   : > { %v1249_v40 = vadd.f32 %v1245_v48, %v4197_v29  ;;  %v1250_v42 = vadd.f32 %v1246_v36, %v4199_v32  ;;  %v1280_v36 = vrot.slane %v4325_v19, 7 }
 0x4b7   : > { %v2655_v43 = vmul.f32 -1.442695, %v1230_v39  ;;  %v2656_v45 = vmul.f32 -1.442695, %v1231_v24 }
 0x4b8   : > { %v2657_v51 = vmul.f32 -1.442695, %v1249_v40  ;;  %v2658_v53 = vmul.f32 -1.442695, %v1250_v42 }
 0x4b9   : > { %3816 = vpow2.f32 %v2655_v43 }
 0x4ba   : > { %3818 = vpow2.f32 %v2656_v45 }
 0x4bb   : > { %3820 = vpow2.f32 %v2657_v51 }
 0x4bc   : > { %3822 = vpow2.f32 %v2658_v53 }
 0x4c3   : > { %v3817_v59 = vpop.eup %3816 }
 0x4c4   : > { %v3819_v61 = vpop.eup %3818  ;;  %v1238_v50 = vadd.f32 1.0, %v3817_v59 }
 0x4c5   : > { %v3821_v62 = vpop.eup %3820  ;;  %v1239_v3 = vadd.f32 1.0, %v3819_v61 }
 0x4c6   : > { %v3823_v5 = vpop.eup %3822  ;;  %3824 = vrcp.f32 %v1238_v50  ;;  %v1257_v11 = vadd.f32 1.0, %v3821_v62 }
 0x4c7   : > { %3826 = vrcp.f32 %v1239_v3  ;;  %v1258_v12 = vadd.f32 1.0, %v3823_v5 }
 0x4c8   : > { %3828 = vrcp.f32 %v1257_v11 }
 0x4c9   : > { %3830 = vrcp.f32 %v1258_v12 }
 0x4d0   : > { %v3825_v22 = vpop.eup %3824 }
 0x4d1   : > { %v3827_v26 = vpop.eup %3826  ;;  %v1269_v27 = vmul.f32 %v3825_v22, %v1265_v58 }
 0x4d2   : > { %v3829_v35 = vpop.eup %3828  ;;  %v1270_v48 = vmul.f32 %v3827_v26, %v1266_v23 }
 0x4d3   : > { %v3831_v39 = vpop.eup %3830  ;;  %v1271_v24 = vadd.f32 %v1269_v27, %v4208_v16  ;;  %v1283_v40 = vmul.f32 %v3829_v35, %v1279_v31  ;;  %v1275_v6 = vsub.f32 1.0, %v3829_v35 }
 0x4d4   : > { %v1272_v42 = vadd.f32 %v1270_v48, %v4210_v25  ;;  %v1284_v43 = vmul.f32 %v3831_v39, %v1280_v36  ;;  %v1276_v51 = vsub.f32 1.0, %v3831_v39 }
 0x4d5   : > { %3832 = vtanh.f32 %v1271_v24 }
 0x4d6   : > { %3834 = vtanh.f32 %v1272_v42 }
 0x4df   : > { %v3833_v45 = vpop.eup %3832 }
 0x4e0   : > { %v3835_v53 = vpop.eup %3834  ;;  %v1277_v59 = vmul.f32 %v3833_v45, %v1275_v6 }
 0x4e1   : > { %v1278_v61 = vmul.f32 %v3835_v53, %v1276_v51 }
 0x4e2   : > { %v4376_v28 = vadd.f32 %v1283_v40, %v1277_v59 }
 0x4e3   : > { %v4378_v50 = vadd.f32 %v1284_v43, %v1278_v61 }
 0x4e4   : > { %1287 = vst [vmem:[#allocation2] sm:$0x8] %v4376_v28  ;;  %v1291_v19 = vrot.slane %v4376_v28, 3 }
 0x4e5   : > { %1288 = vst [vmem:[#allocation2 + $0x8] sm:$0x8] %v4378_v50  ;;  %v1292_v62 = vrot.slane %v4378_v50, 2 }
 0x4e7   : > { %v1293_v3 = vsel %vm664_vm4, %v1292_v62, %v1291_v19 }
 0x4e8   : > { %1360 = vmatmul.mubr.f32.vlgmr.msra.gmra.mrb[8].mxu0 %v1293_v3  ;;  %3050 = vmatmul.mubr.f32.vlgmr.msra.gmra.mrb[14].mxu1 %v1293_v3 }
 0x4e9   : > { %3520 = vmatpush1.bf16.msra.mxu0 %v4056_v9  ;;  %3551 = vmatpush3.bf16.msra.mxu1 %v4128_v33 }
 0x4ea   : > { %3522 = vmatprep.subr.bf16.mxu0 %v4058_v13  ;;  %3552 = vmatprep.subr.bf16.mxu1 %v3974_v37 }
 0x4eb   : > { %1570 = vmatprep.mubr.f32.mxu0 %v3973_v1  ;;  %3084 = vmatprep.mubr.msk.f32.mxu1 %vm3975_vm3, %v3973_v1 }
 0x4ed   : > { %3524 = vmatpush1.bf16.msra.mxu0 %v4062_v17  ;;  %3554 = vmatpush3.bf16.msra.mxu1 %v4133_v38 }
 0x4ee   : > { %3526 = vmatprep.subr.bf16.mxu0 %v4065_v20  ;;  %3555 = vmatprep.subr.bf16.mxu1 %v3974_v37 }
 0x4f1   : > { %3528 = vmatpush1.bf16.msra.mxu0 %v4068_v30  ;;  %3557 = vmatpush3.bf16.msra.mxu1 %v4139_v41 }
 0x4f2   : > { %3530 = vmatprep.subr.bf16.mxu0 %v4071_v34  ;;  %3558 = vmatprep.subr.bf16.mxu1 %v3974_v37 }
 0x4f5   : > { %3532 = vmatpush1.bf16.msra.mxu0 %v4074_v46  ;;  %3560 = vmatpush3.bf16.msra.mxu1 %v4143_v44 }
 0x4f6   : > { %3534 = vmatprep.subr.bf16.mxu0 %v4077_v47  ;;  %3561 = vmatprep.subr.bf16.mxu1 %v3974_v37 }
 0x4f9   : > { %3536 = vmatpush1.bf16.msra.mxu0 %v4080_v56  ;;  %3563 = vmatpush3.bf16.msra.mxu1 %v4147_v49 }
 0x4fa   : > { %3538 = vmatprep.subr.bf16.mxu0 %v4083_v57  ;;  %3564 = vmatprep.subr.bf16.mxu1 %v3974_v37 }
 0x4fd   : > { %3540 = vmatpush1.bf16.msra.mxu0 %v4086_v0  ;;  %3566 = vmatpush3.bf16.msra.mxu1 %v4151_v52 }
 0x4fe   : > { %3542 = vmatprep.subr.bf16.mxu0 %v4089_v2  ;;  %3567 = vmatprep.subr.bf16.mxu1 %v3974_v37 }
 0x501   : > { %3544 = vmatpush1.bf16.msra.mxu0 %v4092_v7  ;;  %3569 = vmatpush3.bf16.msra.mxu1 %v4155_v55 }
 0x502   : > { %3546 = vmatprep.subr.bf16.mxu0 %v4095_v10  ;;  %3570 = vmatprep.subr.bf16.mxu1 %v3974_v37 }
 0x505   : > { %3548 = vmatpush1.bf16.msra.mxu0 %v4098_v14  ;;  %3572 = vmatpush3.bf16.msra.mxu1 %v4159_v60 }
 0x506   : > { %3574 = vmatprep.subr.bf16.mxu0 %v4054_v8  ;;  %3605 = vmatprep.subr.bf16.mxu1 %v3974_v37 }
 0x5bb   : > { %v1361_v5 = vpop.f32.mrb[8].mxu0  ;;  %v1432_v11 = vpop.f32.mrb[14].mxu1 }
 0x5bc   : > { %v1437_v12 = vrot.slane %v1361_v5, 4  ;;  %v1438_v15 = vrot.slane %v1361_v5, 5  ;;  %v1363_v58 = vpop.f32.mrb[9].mxu0  ;;  %v3051_v22 = vpop.f32.mrb[15].mxu1  ;;  %v1474_v19 = vadd.f32 %v1432_v11, %v4204_v54 }
 0x5bd   : > { %v1456_v23 = vrot.slane %v1363_v58, 4  ;;  %v1457_v26 = vrot.slane %v1363_v58, 5  ;;  %v1490_v58 = vrot.slane %v4376_v28, 7 }
 0x5be   : > { %v1441_v27 = vadd.f32 %v1437_v12, %v4190_v18  ;;  %v1442_v31 = vadd.f32 %v1438_v15, %v4192_v21  ;;  %v1476_v62 = vrot.slane %v1474_v19, 4  ;;  %v1477_v5 = vrot.slane %v1474_v19, 5 }
 0x5bf   : > { %v1460_v35 = vadd.f32 %v1456_v23, %v4197_v29  ;;  %v1461_v48 = vadd.f32 %v1457_v26, %v4199_v32  ;;  %v1491_v26 = vrot.slane %v4378_v50, 7 }
 0x5c0   : > { %v2659_v36 = vmul.f32 -1.442695, %v1441_v27  ;;  %v2660_v39 = vmul.f32 -1.442695, %v1442_v31 }
 0x5c1   : > { %v2661_v24 = vmul.f32 -1.442695, %v1460_v35  ;;  %v2662_v40 = vmul.f32 -1.442695, %v1461_v48 }
 0x5c2   : > { %3836 = vpow2.f32 %v2659_v36 }
 0x5c3   : > { %3838 = vpow2.f32 %v2660_v39 }
 0x5c4   : > { %3840 = vpow2.f32 %v2661_v24 }
 0x5c5   : > { %3842 = vpow2.f32 %v2662_v40 }
 0x5cc   : > { %v3837_v42 = vpop.eup %3836 }
 0x5cd   : > { %v3839_v43 = vpop.eup %3838  ;;  %v1449_v6 = vadd.f32 1.0, %v3837_v42 }
 0x5ce   : > { %v3841_v45 = vpop.eup %3840  ;;  %v1450_v51 = vadd.f32 1.0, %v3839_v43 }
 0x5cf   : > { %v3843_v53 = vpop.eup %3842  ;;  %3844 = vrcp.f32 %v1449_v6  ;;  %v1468_v59 = vadd.f32 1.0, %v3841_v45 }
 0x5d0   : > { %3846 = vrcp.f32 %v1450_v51  ;;  %v1469_v61 = vadd.f32 1.0, %v3843_v53 }
 0x5d1   : > { %3848 = vrcp.f32 %v1468_v59 }
 0x5d2   : > { %3850 = vrcp.f32 %v1469_v61 }
 0x5d9   : > { %v3845_v3 = vpop.eup %3844 }
 0x5da   : > { %v3847_v12 = vpop.eup %3846  ;;  %v1480_v15 = vmul.f32 %v3845_v3, %v1476_v62 }
 0x5db   : > { %v3849_v22 = vpop.eup %3848  ;;  %v1481_v23 = vmul.f32 %v3847_v12, %v1477_v5 }
 0x5dc   : > { %v3851_v27 = vpop.eup %3850  ;;  %v1482_v31 = vadd.f32 %v1480_v15, %v4208_v16  ;;  %v1494_v35 = vmul.f32 %v3849_v22, %v1490_v58  ;;  %v1486_v11 = vsub.f32 1.0, %v3849_v22 }
 0x5dd   : > { %v1483_v48 = vadd.f32 %v1481_v23, %v4210_v25  ;;  %v1495_v36 = vmul.f32 %v3851_v27, %v1491_v26  ;;  %v1487_v24 = vsub.f32 1.0, %v3851_v27 }
 0x5de   : > { %3852 = vtanh.f32 %v1482_v31 }
 0x5df   : > { %3854 = vtanh.f32 %v1483_v48 }
 0x5e8   : > { %v3853_v39 = vpop.eup %3852 }
 0x5e9   : > { %v3855_v40 = vpop.eup %3854  ;;  %v1488_v42 = vmul.f32 %v3853_v39, %v1486_v11 }
 0x5ea   : > { %v1489_v43 = vmul.f32 %v3855_v40, %v1487_v24 }
 0x5eb   : > { %v4429_v28 = vadd.f32 %v1494_v35, %v1488_v42 }
 0x5ec   : > { %v4431_v6 = vadd.f32 %v1495_v36, %v1489_v43 }
 0x5ed   : > { %1498 = vst [vmem:[#allocation2] sm:$0x10] %v4429_v28  ;;  %v1502_v50 = vrot.slane %v4429_v28, 4 }
 0x5ee   : > { %1499 = vst [vmem:[#allocation2 + $0x8] sm:$0x10] %v4431_v6  ;;  %v1503_v45 = vrot.slane %v4431_v6, 3 }
 0x5f0   : > { %v1504_v51 = vsel %vm664_vm4, %v1503_v45, %v1502_v50 }
 0x5f1   : > { %1571 = vmatmul.mubr.f32.vlgmr.msra.gmra.mrb[10].mxu0 %v1504_v51  ;;  %3085 = vmatmul.mubr.f32.vlgmr.msra.gmra.mrb[16].mxu1 %v1504_v51 }
 0x5f2   : > { %3576 = vmatpush1.bf16.msra.mxu0 %v4056_v9  ;;  %3607 = vmatpush3.bf16.msra.mxu1 %v4128_v33 }
 0x5f3   : > { %3578 = vmatprep.subr.bf16.mxu0 %v4058_v13  ;;  %3608 = vmatprep.subr.bf16.mxu1 %v3974_v37 }
 0x5f4   : > { %1781 = vmatprep.mubr.f32.mxu0 %v3973_v1  ;;  %3119 = vmatprep.mubr.msk.f32.mxu1 %vm3975_vm3, %v3973_v1 }
 0x5f6   : > { %3580 = vmatpush1.bf16.msra.mxu0 %v4062_v17  ;;  %3610 = vmatpush3.bf16.msra.mxu1 %v4133_v38 }
 0x5f7   : > { %3582 = vmatprep.subr.bf16.mxu0 %v4065_v20  ;;  %3611 = vmatprep.subr.bf16.mxu1 %v3974_v37 }
 0x5fa   : > { %3584 = vmatpush1.bf16.msra.mxu0 %v4068_v30  ;;  %3613 = vmatpush3.bf16.msra.mxu1 %v4139_v41 }
 0x5fb   : > { %3586 = vmatprep.subr.bf16.mxu0 %v4071_v34  ;;  %3614 = vmatprep.subr.bf16.mxu1 %v3974_v37 }
 0x5fe   : > { %3588 = vmatpush1.bf16.msra.mxu0 %v4074_v46  ;;  %3616 = vmatpush3.bf16.msra.mxu1 %v4143_v44 }
 0x5ff   : > { %3590 = vmatprep.subr.bf16.mxu0 %v4077_v47  ;;  %3617 = vmatprep.subr.bf16.mxu1 %v3974_v37 }
 0x602   : > { %3592 = vmatpush1.bf16.msra.mxu0 %v4080_v56  ;;  %3619 = vmatpush3.bf16.msra.mxu1 %v4147_v49 }
 0x603   : > { %3594 = vmatprep.subr.bf16.mxu0 %v4083_v57  ;;  %3620 = vmatprep.subr.bf16.mxu1 %v3974_v37 }
 0x606   : > { %3596 = vmatpush1.bf16.msra.mxu0 %v4086_v0  ;;  %3622 = vmatpush3.bf16.msra.mxu1 %v4151_v52 }
 0x607   : > { %3598 = vmatprep.subr.bf16.mxu0 %v4089_v2  ;;  %3623 = vmatprep.subr.bf16.mxu1 %v3974_v37 }
 0x60a   : > { %3600 = vmatpush1.bf16.msra.mxu0 %v4092_v7  ;;  %3625 = vmatpush3.bf16.msra.mxu1 %v4155_v55 }
 0x60b   : > { %3602 = vmatprep.subr.bf16.mxu0 %v4095_v10  ;;  %3626 = vmatprep.subr.bf16.mxu1 %v3974_v37 }
 0x60e   : > { %3604 = vmatpush1.bf16.msra.mxu0 %v4098_v14  ;;  %3628 = vmatpush3.bf16.msra.mxu1 %v4159_v60 }
 0x60f   : > { %3630 = vmatprep.subr.bf16.mxu0 %v4054_v8  ;;  %3661 = vmatprep.subr.bf16.mxu1 %v3974_v37 }
 0x6c4   : > { %v1572_v53 = vpop.f32.mrb[10].mxu0  ;;  %v1643_v59 = vpop.f32.mrb[16].mxu1 }
 0x6c5   : > { %v1648_v61 = vrot.slane %v1572_v53, 3  ;;  %v1649_v19 = vrot.slane %v1572_v53, 4  ;;  %v1574_v62 = vpop.f32.mrb[11].mxu0  ;;  %v3086_v3 = vpop.f32.mrb[17].mxu1  ;;  %v1685_v43 = vadd.f32 %v1643_v59, %v4204_v54 }
 0x6c6   : > { %v1667_v5 = vrot.slane %v1574_v62, 3  ;;  %v1668_v12 = vrot.slane %v1574_v62, 4 }
 0x6c7   : > { %v1652_v15 = vadd.f32 %v1648_v61, %v4190_v18  ;;  %v1653_v58 = vadd.f32 %v1649_v19, %v4192_v21  ;;  %v1687_v50 = vrot.slane %v1685_v43, 3  ;;  %v1688_v51 = vrot.slane %v1685_v43, 4 }
 0x6c8   : > { %v1671_v22 = vadd.f32 %v1667_v5, %v4197_v29  ;;  %v1672_v23 = vadd.f32 %v1668_v12, %v4199_v32  ;;  %v1701_v19 = vrot.slane %v4429_v28, 7  ;;  %v1702_v5 = vrot.slane %v4431_v6, 7 }
 0x6c9   : > { %v2663_v26 = vmul.f32 -1.442695, %v1652_v15  ;;  %v2664_v8 = vmul.f32 -1.442695, %v1653_v58 }
 0x6ca   : > { %v2665_v27 = vmul.f32 -1.442695, %v1671_v22  ;;  %v2666_v31 = vmul.f32 -1.442695, %v1672_v23 }
 0x6cb   : > { %3856 = vpow2.f32 %v2663_v26 }
 0x6cc   : > { %3858 = vpow2.f32 %v2664_v8 }
 0x6cd   : > { %3860 = vpow2.f32 %v2665_v27 }
 0x6ce   : > { %3862 = vpow2.f32 %v2666_v31 }
 0x6d5   : > { %v3857_v35 = vpop.eup %3856 }
 0x6d6   : > { %v3859_v48 = vpop.eup %3858  ;;  %v1660_v36 = vadd.f32 1.0, %v3857_v35 }
 0x6d7   : > { %v3861_v11 = vpop.eup %3860  ;;  %v1661_v39 = vadd.f32 1.0, %v3859_v48 }
 0x6d8   : > { %v3863_v24 = vpop.eup %3862  ;;  %3864 = vrcp.f32 %v1660_v36  ;;  %v1679_v40 = vadd.f32 1.0, %v3861_v11 }
 0x6d9   : > { %3866 = vrcp.f32 %v1661_v39  ;;  %v1680_v42 = vadd.f32 1.0, %v3863_v24 }
 0x6da   : > { %3868 = vrcp.f32 %v1679_v40 }
 0x6db   : > { %3870 = vrcp.f32 %v1680_v42 }
 0x6e2   : > { %v3865_v45 = vpop.eup %3864 }
 0x6e3   : > { %v3867_v53 = vpop.eup %3866  ;;  %v1691_v61 = vmul.f32 %v3865_v45, %v1687_v50 }
 0x6e4   : > { %v3869_v62 = vpop.eup %3868  ;;  %v1692_v3 = vmul.f32 %v3867_v53, %v1688_v51 }
 0x6e5   : > { %v3871_v12 = vpop.eup %3870  ;;  %v1693_v15 = vadd.f32 %v1691_v61, %v4208_v16  ;;  %v1705_v58 = vmul.f32 %v3869_v62, %v1701_v19  ;;  %v1697_v59 = vsub.f32 1.0, %v3869_v62 }
 0x6e6   : > { %v1694_v22 = vadd.f32 %v1692_v3, %v4210_v25  ;;  %v1706_v23 = vmul.f32 %v3871_v12, %v1702_v5  ;;  %v1698_v8 = vsub.f32 1.0, %v3871_v12 }
 0x6e7   : > { %3872 = vtanh.f32 %v1693_v15 }
 0x6e8   : > { %3874 = vtanh.f32 %v1694_v22 }
 0x6f1   : > { %v3873_v26 = vpop.eup %3872 }
 0x6f2   : > { %v3875_v27 = vpop.eup %3874  ;;  %v1699_v31 = vmul.f32 %v3873_v26, %v1697_v59 }
 0x6f3   : > { %v1700_v35 = vmul.f32 %v3875_v27, %v1698_v8 }
 0x6f4   : > { %v4482_v28 = vadd.f32 %v1705_v58, %v1699_v31 }
 0x6f5   : > { %v4484_v48 = vadd.f32 %v1706_v23, %v1700_v35 }
 0x6f6   : > { %1709 = vst [vmem:[#allocation2] sm:$0x20] %v4482_v28  ;;  %v1713_v6 = vrot.slane %v4482_v28, 5  ;;  %v1912_v50 = vrot.slane %v4482_v28, 7  ;;  %v2135_v28 = vld [vmem:[#allocation3 + $0x228] sm:$0xff] }
 0x6f7   : > { %1710 = vst [vmem:[#allocation2 + $0x8] sm:$0x20] %v4484_v48  ;;  %v1714_v36 = vrot.slane %v4484_v48, 4  ;;  %v1913_v53 = vrot.slane %v4484_v48, 7  ;;  %v2136_v48 = vld [vmem:[#allocation3 + $0x240] sm:$0xff] }
 0x6f9   : > { %v1715_v11 = vsel %vm664_vm4, %v1714_v36, %v1713_v6  ;;  %v3685_v6 = vpack.c.bf16 %v2136_v48, %v2135_v28  ;;  %v2137_v36 = vld [vmem:[#allocation3 + $0x258] sm:$0xff] }
 0x6fa   : > { %1782 = vmatmul.mubr.f32.vlgmr.msra.gmra.mrb[12].mxu0 %v1715_v11  ;;  %3120 = vmatmul.mubr.f32.vlgmr.msra.gmra.mrb[18].mxu1 %v1715_v11  ;;  %v2138_v11 = vld [vmem:[#allocation3 + $0x270] sm:$0xff] }
 0x6fb   : > { %3632 = vmatpush1.bf16.msra.mxu0 %v4056_v9  ;;  %3663 = vmatpush3.bf16.msra.mxu1 %v4128_v33 }
 0x6fc   : > { %3634 = vmatprep.subr.bf16.mxu0 %v4058_v13  ;;  %3664 = vmatprep.subr.bf16.mxu1 %v3974_v37 }
 0x6fd   : > { %1992 = vmatprep.mubr.f32.mxu0 %v3973_v1  ;;  %3154 = vmatprep.mubr.msk.f32.mxu1 %vm3975_vm3, %v3973_v1 }
 0x6ff   : > { %3636 = vmatpush1.bf16.msra.mxu0 %v4062_v17  ;;  %3666 = vmatpush3.bf16.msra.mxu1 %v4133_v38 }
 0x700   : > { %3638 = vmatprep.subr.bf16.mxu0 %v4065_v20  ;;  %3667 = vmatprep.subr.bf16.mxu1 %v3974_v37 }
 0x703   : > { %3640 = vmatpush1.bf16.msra.mxu0 %v4068_v30  ;;  %3669 = vmatpush3.bf16.msra.mxu1 %v4139_v41 }
 0x704   : > { %3642 = vmatprep.subr.bf16.mxu0 %v4071_v34  ;;  %3670 = vmatprep.subr.bf16.mxu1 %v3974_v37 }
 0x707   : > { %3644 = vmatpush1.bf16.msra.mxu0 %v4074_v46  ;;  %3672 = vmatpush3.bf16.msra.mxu1 %v4143_v44 }
 0x708   : > { %3646 = vmatprep.subr.bf16.mxu0 %v4077_v47  ;;  %3673 = vmatprep.subr.bf16.mxu1 %v3974_v37 }
 0x70b   : > { %3648 = vmatpush1.bf16.msra.mxu0 %v4080_v56  ;;  %3675 = vmatpush3.bf16.msra.mxu1 %v4147_v49 }
 0x70c   : > { %3650 = vmatprep.subr.bf16.mxu0 %v4083_v57  ;;  %3676 = vmatprep.subr.bf16.mxu1 %v3974_v37 }
 0x70f   : > { %3652 = vmatpush1.bf16.msra.mxu0 %v4086_v0  ;;  %3678 = vmatpush3.bf16.msra.mxu1 %v4151_v52 }
 0x710   : > { %3654 = vmatprep.subr.bf16.mxu0 %v4089_v2  ;;  %3679 = vmatprep.subr.bf16.mxu1 %v3974_v37 }
 0x713   : > { %3656 = vmatpush1.bf16.msra.mxu0 %v4092_v7  ;;  %3681 = vmatpush3.bf16.msra.mxu1 %v4155_v55 }
 0x714   : > { %3658 = vmatprep.subr.bf16.mxu0 %v4095_v10  ;;  %3682 = vmatprep.subr.bf16.mxu1 %v3974_v37 }
 0x717   : > { %3660 = vmatpush1.bf16.msra.mxu0 %v4098_v14  ;;  %3684 = vmatpush3.bf16.msra.mxu1 %v4159_v60 }
 0x718   : > { %3686 = vmatprep.subr.bf16.mxu0 %v3685_v6 }
 0x7cd   : > { %v1783_v1 = vpop.f32.mrb[12].mxu0  ;;  %v1854_v9 = vpop.f32.mrb[18].mxu1 }
 0x7ce   : > { %v1859_v13 = vrot.slane %v1783_v1, 2  ;;  %v1860_v17 = vrot.slane %v1783_v1, 3  ;;  %v1785_v20 = vpop.f32.mrb[13].mxu0  ;;  %v3121_v30 = vpop.f32.mrb[19].mxu1  ;;  %v1896_v60 = vadd.f32 %v1854_v9, %v4204_v54  ;;  %v3689_v1 = vpack.c.bf16 %v2138_v11, %v2137_v36  ;;  %v2139_v9 = vld [vmem:[#allocation3 + $0x288] sm:$0xff] }
 0x7cf   : > { %v1878_v34 = vrot.slane %v1785_v20, 2  ;;  %v1879_v46 = vrot.slane %v1785_v20, 3  ;;  %v2141_v20 = vld [vmem:[#allocation3 + $0x2b8] sm:$0xff]  ;;  %v2142_v30 = vld [vmem:[#allocation3 + $0x2d0] sm:$0xff] }
 0x7d0   : > { %v1863_v47 = vadd.f32 %v1859_v13, %v4190_v18  ;;  %v1864_v56 = vadd.f32 %v1860_v17, %v4192_v21  ;;  %v1898_v39 = vrot.slane %v1896_v60, 2  ;;  %v1899_v40 = vrot.slane %v1896_v60, 3  ;;  %v2140_v13 = vld [vmem:[#allocation3 + $0x2a0] sm:$0xff] }
 0x7d1   : > { %v1882_v57 = vadd.f32 %v1878_v34, %v4197_v29  ;;  %v1883_v0 = vadd.f32 %v1879_v46, %v4199_v32  ;;  %v3693_v17 = vpack.c.bf16 %v2140_v13, %v2139_v9  ;;  %v3697_v34 = vpack.c.bf16 %v2142_v30, %v2141_v20  ;;  %v2143_v46 = vld [vmem:[#allocation3 + $0x2e8] sm:$0xff] }
 0x7d2   : > { %v2667_v2 = vmul.f32 -1.442695, %v1863_v47  ;;  %v2668_v7 = vmul.f32 -1.442695, %v1864_v56  ;;  %v2144_v47 = vld [vmem:[#allocation3 + $0x300] sm:$0xff] }
 0x7d3   : > { %v2669_v10 = vmul.f32 -1.442695, %v1882_v57  ;;  %v2670_v14 = vmul.f32 -1.442695, %v1883_v0  ;;  %v3701_v56 = vpack.c.bf16 %v2144_v47, %v2143_v46  ;;  %v2145_v57 = vld [vmem:[#allocation3 + $0x318] sm:$0xff]  ;;  %v2146_v0 = vld [vmem:[#allocation3 + $0x330] sm:$0xff] }
 0x7d4   : > { %3876 = vpow2.f32 %v2667_v2  ;;  %v3705_v2 = vpack.c.bf16 %v2146_v0, %v2145_v57  ;;  %v2233_v47 = vld [vmem:[#allocation3 + $0x3c0] sm:$0xff]  ;;  %v4552_v57 = vld [vmem:[#allocation3 + $0x438] sm:$0xff] }
 0x7d5   : > { %3878 = vpow2.f32 %v2668_v7  ;;  %v2147_v7 = vld [vmem:[#allocation3 + $0x348] sm:$0xff] }
 0x7d6   : > { %3880 = vpow2.f32 %v2669_v10  ;;  %v2148_v10 = vld [vmem:[#allocation3 + $0x360] sm:$0xff] }
 0x7d7   : > { %3882 = vpow2.f32 %v2670_v14  ;;  %v3709_v14 = vpack.c.bf16 %v2148_v10, %v2147_v7 }
 0x7de   : > { %v3877_v33 = vpop.eup %3876 }
 0x7df   : > { %v3879_v37 = vpop.eup %3878  ;;  %v1871_v38 = vadd.f32 1.0, %v3877_v33  ;;  %v2149_v33 = vld [vmem:[#allocation3 + $0x378] sm:$0xff] }
 0x7e0   : > { %v3881_v41 = vpop.eup %3880  ;;  %v1872_v44 = vadd.f32 1.0, %v3879_v37  ;;  %v2150_v37 = vld [vmem:[#allocation3 + $0x390] sm:$0xff] }
 0x7e1   : > { %v3883_v49 = vpop.eup %3882  ;;  %3884 = vrcp.f32 %v1871_v38  ;;  %v1890_v52 = vadd.f32 1.0, %v3881_v41  ;;  %v3713_v38 = vpack.c.bf16 %v2150_v37, %v2149_v33 }
 0x7e2   : > { %3886 = vrcp.f32 %v1872_v44  ;;  %v1891_v55 = vadd.f32 1.0, %v3883_v49 }
 0x7e3   : > { %3888 = vrcp.f32 %v1890_v52 }
 0x7e4   : > { %3890 = vrcp.f32 %v1891_v55 }
 0x7eb   : > { %v3885_v24 = vpop.eup %3884 }
 0x7ec   : > { %v3887_v42 = vpop.eup %3886  ;;  %v1902_v43 = vmul.f32 %v3885_v24, %v1898_v39 }
 0x7ed   : > { %v3889_v45 = vpop.eup %3888  ;;  %v1903_v51 = vmul.f32 %v3887_v42, %v1899_v40 }
 0x7ee   : > { %v3891_v61 = vpop.eup %3890  ;;  %v1904_v19 = vadd.f32 %v1902_v43, %v4208_v16  ;;  %v1916_v62 = vmul.f32 %v3889_v45, %v1912_v50  ;;  %v1908_v12 = vsub.f32 1.0, %v3889_v45 }
 0x7ef   : > { %v1905_v3 = vadd.f32 %v1903_v51, %v4210_v25  ;;  %v1917_v5 = vmul.f32 %v3891_v61, %v1913_v53  ;;  %v1909_v58 = vsub.f32 1.0, %v3891_v61 }
 0x7f0   : > { %3892 = vtanh.f32 %v1904_v19 }
 0x7f1   : > { %3894 = vtanh.f32 %v1905_v3 }
 0x7fa   : > { %v3893_v15 = vpop.eup %3892 }
 0x7fb   : > { %v3895_v22 = vpop.eup %3894  ;;  %v1910_v23 = vmul.f32 %v3893_v15, %v1908_v12 }
 0x7fc   : > { %v1911_v59 = vmul.f32 %v3895_v22, %v1909_v58 }
 0x7fd   : > { %v4533_v26 = vadd.f32 %v1916_v62, %v1910_v23 }
 0x7fe   : > { %v4535_v8 = vadd.f32 %v1917_v5, %v1911_v59 }
 0x7ff   : > { %1920 = vst [vmem:[#allocation2] sm:$0x40] %v4533_v26  ;;  %v1924_v27 = vrot.slane %v4533_v26, 6  ;;  %v2123_v59 = vrot.slane %v4533_v26, 7 }
 0x800   : > { %1921 = vst [vmem:[#allocation2 + $0x8] sm:$0x40] %v4535_v8  ;;  %v1925_v31 = vrot.slane %v4535_v8, 5 }
 0x802   : > { %v1926_v35 = vsel %vm664_vm4, %v1925_v31, %v1924_v27 }
 0x803   : > { %1993 = vmatmul.mubr.f32.vlgmr.msra.gmra.mrb[14].mxu0 %v1926_v35  ;;  %3155 = vmatmul.mubr.f32.vlgmr.msra.gmra.mrb[20].mxu1 %v1926_v35  ;;  %v2124_v35 = vrot.slane %v4535_v8, 7 }
 0x804   : > { %3688 = vmatpush3.bf16.msra.mxu0 %v3685_v6 }
 0x805   : > { %3690 = vmatprep.subr.bf16.mxu0 %v3689_v1 }
 0x808   : > { %3692 = vmatpush3.bf16.msra.mxu0 %v3689_v1 }
 0x809   : > { %3694 = vmatprep.subr.bf16.mxu0 %v3693_v17 }
 0x80c   : > { %3696 = vmatpush3.bf16.msra.mxu0 %v3693_v17 }
 0x80d   : > { %3698 = vmatprep.subr.bf16.mxu0 %v3697_v34 }
 0x810   : > { %3700 = vmatpush3.bf16.msra.mxu0 %v3697_v34 }
 0x811   : > { %3702 = vmatprep.subr.bf16.mxu0 %v3701_v56 }
 0x814   : > { %3704 = vmatpush3.bf16.msra.mxu0 %v3701_v56  ;;  %v2153_v56 = vsub.s32 2, %v4184_v63 }
 0x815   : > { %3706 = vmatprep.subr.bf16.mxu0 %v3705_v2 }
 0x816   : > { %v2154_v0 = vrot.slane %v4552_v57, %v2153_v56 }
 0x818   : > { %3708 = vmatpush3.bf16.msra.mxu0 %v3705_v2 }
 0x819   : > { %3710 = vmatprep.subr.bf16.mxu0 %v3709_v14 }
 0x81c   : > { %3712 = vmatpush3.bf16.msra.mxu0 %v3709_v14 }
 0x81d   : > { %3714 = vmatprep.subr.bf16.mxu0 %v3713_v38 }
 0x820   : > { %3716 = vmatpush3.bf16.msra.mxu0 %v3713_v38  ;;  %v2236_v38 = vsub.s32 3, %v4184_v63 }
 0x8d6   : > { %v1994_v41 = vpop.f32.mrb[14].mxu0  ;;  %v2065_v44 = vpop.f32.mrb[20].mxu1 }
 0x8d7   : > { %v2070_v49 = vrot.slane %v1994_v41, 1  ;;  %v2071_v52 = vrot.slane %v1994_v41, 2  ;;  %v1996_v55 = vpop.f32.mrb[15].mxu0  ;;  %v3156_v60 = vpop.f32.mrb[21].mxu1  ;;  %v2237_v41 = vrot.slane %v4552_v57, %v2236_v38 }
 0x8d8   : > { %v2089_v39 = vrot.slane %v1996_v55, 1  ;;  %v2090_v24 = vrot.slane %v1996_v55, 2 }
 0x8d9   : > { %v2074_v40 = vadd.f32 %v2070_v49, %v4190_v18  ;;  %v2075_v42 = vadd.f32 %v2071_v52, %v4192_v21 }
 0x8da   : > { %v2093_v43 = vadd.f32 %v2089_v39, %v4197_v29  ;;  %v2094_v50 = vadd.f32 %v2090_v24, %v4199_v32  ;;  %v2107_v32 = vadd.f32 %v2065_v44, %v4204_v54 }
 0x8db   : > { %v2671_v45 = vmul.f32 -1.442695, %v2074_v40  ;;  %v2672_v51 = vmul.f32 -1.442695, %v2075_v42 }
 0x8dc   : > { %v2673_v53 = vmul.f32 -1.442695, %v2093_v43  ;;  %v2674_v61 = vmul.f32 -1.442695, %v2094_v50  ;;  %v2109_v15 = vrot.slane %v2107_v32, 1  ;;  %v2110_v22 = vrot.slane %v2107_v32, 2 }
 0x8dd   : > { %3896 = vpow2.f32 %v2671_v45  ;;  %v2372_v50 = vld [vmem:[#allocation3 + $0x3d8] sm:$0xff]  ;;  %v2373_v45 = vld [vmem:[#allocation3 + $0x3f0] sm:$0xff] }
 0x8de   : > { %3898 = vpow2.f32 %v2672_v51  ;;  %v3721_v51 = vpack.c.bf16 %v2373_v45, %v2372_v50 }
 0x8df   : > { %3900 = vpow2.f32 %v2673_v53  ;;  %v2324_v53 = vld [vmem:[%s194_s10] sm:$0x1] }
 0x8e0   : > { %3902 = vpow2.f32 %v2674_v61  ;;  %3722 = vmatprep.subr.bf16.mxu1 %v3721_v51 }
 0x8e1   : > { %3724 = vmatpush3.bf16.msra.mxu1 %v3721_v51 }
 0x8e7   : > { %v3897_v19 = vpop.eup %3896 }
 0x8e8   : > { %v3899_v62 = vpop.eup %3898  ;;  %v2082_v3 = vadd.f32 1.0, %v3897_v19 }
 0x8e9   : > { %v3901_v5 = vpop.eup %3900  ;;  %v2083_v12 = vadd.f32 1.0, %v3899_v62 }
 0x8ea   : > { %v3903_v18 = vpop.eup %3902  ;;  %3904 = vrcp.f32 %v2082_v3  ;;  %v2101_v21 = vadd.f32 1.0, %v3901_v5 }
 0x8eb   : > { %3906 = vrcp.f32 %v2083_v12  ;;  %v2102_v29 = vadd.f32 1.0, %v3903_v18  ;;  %v2461_v12 = vld [vmem:[#allocation3 + $0x408] sm:$0xff]  ;;  %v2462_v18 = vld [vmem:[#allocation3 + $0x420] sm:$0xff] }
 0x8ec   : > { %3908 = vrcp.f32 %v2101_v21  ;;  %v3725_v21 = vpack.c.bf16 %v2462_v18, %v2461_v12 }
 0x8ed   : > { %3910 = vrcp.f32 %v2102_v29  ;;  %v2376_v29 = vsub.s32 4, %v4184_v63 }
 0x8ee   : > { %3726 = vmatprep.subr.bf16.mxu1 %v3725_v21 }
 0x8ef   : > { %v2377_v32 = vrot.slane %v4552_v57, %v2376_v29 }
 0x8f4   : > { %v3905_v58 = vpop.eup %3904 }
 0x8f5   : > { %v3907_v23 = vpop.eup %3906  ;;  %v2113_v27 = vmul.f32 %v3905_v58, %v2109_v15 }
 0x8f6   : > { %v3909_v31 = vpop.eup %3908  ;;  %v2114_v28 = vmul.f32 %v3907_v23, %v2110_v22 }
 0x8f7   : > { %v3911_v48 = vpop.eup %3910  ;;  %v2115_v6 = vadd.f32 %v2113_v27, %v4208_v16  ;;  %v2127_v36 = vmul.f32 %v3909_v31, %v2123_v59  ;;  %v2119_v54 = vsub.f32 1.0, %v3909_v31  ;;  %v2232_v16 = vld [vmem:[#allocation3 + $0x3a8] sm:$0xff]  ;;  %v2465_v27 = vsub.s32 5, %v4184_v63 }
 0x8f8   : > { %v2116_v11 = vadd.f32 %v2114_v28, %v4210_v25  ;;  %v2128_v1 = vmul.f32 %v3911_v48, %v2124_v35  ;;  %v2120_v13 = vsub.f32 1.0, %v3911_v48  ;;  %v3717_v25 = vpack.c.bf16 %v2233_v47, %v2232_v16 }
 0x8f9   : > { %3912 = vtanh.f32 %v2115_v6  ;;  %v2466_v31 = vrot.slane %v4552_v57, %v2465_v27 }
 0x8fa   : > { %3914 = vtanh.f32 %v2116_v11  ;;  %3718 = vmatprep.subr.bf16.mxu0 %v3717_v25 }
 0x903   : > { %v3913_v9 = vpop.eup %3912 }
 0x904   : > { %v3915_v17 = vpop.eup %3914  ;;  %v2121_v20 = vmul.f32 %v3913_v9, %v2119_v54 }
 0x905   : > { %v2122_v26 = vmul.f32 %v3915_v17, %v2120_v13 }
 0x906   : > { %v2129_v30 = vadd.f32 %v2127_v36, %v2121_v20 }
 0x907   : > { %v2130_v34 = vadd.f32 %v2128_v1, %v2122_v26 }
 0x908   : > { %2131 = vst [vmem:[#allocation2] sm:$0x80] %v2129_v30 }
 0x909   : > { %2132 = vst [vmem:[#allocation2 + $0x8] sm:$0x80] %v2130_v34 }
 0x90f   : > { %v2133_v8 = vld [vmem:[#allocation2] sm:$0xff] }
 0x910   : > { %3189 = vmatprep.mubr.f32.mxu0 %v2133_v8  ;;  %v2134_v46 = vld [vmem:[#allocation2 + $0x8] sm:$0xff] }
 0x911   : > { %3190 = vmatmul.mubr.f32.vlgmr.msra.gmra.mrb[16].mxu0 %v2134_v46 }
 0x912   : > { %3720 = vmatpush3.bf16.msra.mxu0 %v3717_v25 }
 0x9e4   : > { %v3191_v2 = vpop.f32.mrb[16].mxu0 }
 0x9e5   : > { %v2227_v7 = vadd.f32 %v3191_v2, %v2154_v0  ;;  %v2221_v10 = vpop.f32.mrb[17].mxu0 }
 0x9e6   : > { %v2222_v14 = vadd.f32 %v2221_v10, %v2154_v0 }
 0x9e8   : > { %3916 = vtanh.f32 %v2222_v14 }
 0x9e9   : > { %3918 = vtanh.f32 %v2227_v7 }
 0x9f2   : > { %v3917_v33 = vpop.eup %3916 }
 0x9f3   : > { %v3919_v37 = vpop.eup %3918  ;;  %3196 = vmatprep.mubr.msk.f32.mxu0 %vm2238_vm5, %v3917_v33 }
 0x9f4   : > { %3197 = vmatmul.mubr.msk.f32.vlgmr.msra.gmra.mrb[18].mxu0 %vm2238_vm5, %v3919_v37 }
 0xac7   : > { %v3198_v44 = vpop.f32.mrb[18].mxu0 }
 0xac8   : > { %v2311_v49 = vpop.f32.mrb[19].mxu0  ;;  %v2317_v52 = vadd.f32 %v3198_v44, %v2237_v41 }
 0xac9   : > { %v2312_v55 = vadd.f32 %v2311_v49, %v2237_v41 }
 0xaca   : > { %v2322_v39 = vmul.f32 1.442695, %v2317_v52 }
 0xacb   : > { %v2320_v60 = vmul.f32 1.442695, %v2312_v55 }
 0xacd   : > { %3920 = vpow2.f32 %v2320_v60 }
 0xace   : > { %3922 = vpow2.f32 %v2322_v39 }
 0xad7   : > { %v3921_v24 = vpop.eup %3920 }
 0xad8   : > { %2327 = vrot.lane.b32.xlu1 %v3921_v24, %s3976_s7  ;;  %v3923_v40 = vpop.eup %3922 }
 0xadc   : > { %2329 = vrot.lane.b32.xlu1 %v3923_v40, %s3976_s7 }
 0xb4a   : > { %v2328_v42 = vpop.permute.xlu1 %2327 }
 0xb4b   : > { %2333 = vxpose.xlu0.b32.start [1/2] (short) (narrow) %v2328_v42, 8 }
 0xb4e   : > { %v2330_v43 = vpop.permute.xlu1 %2329 }
 0xb4f   : > { %2334 = vxpose.xlu0.b32.end [2/2] (short) (narrow) %v2330_v43, 8 }
 0xbcb   : > { %v2349_v61 = vpop.trf.xlu0 }
 0xbcc   : > { %v2365_v19 = vmul.f32 %v2349_v61, %v2324_v53 }
 0xbce   : > { %v2369_v62 = vrot.slane %v2365_v19, %v4187_v4 }
 0xbd0   : > { %v2370_v3 = vadd.f32 %v2369_v62, %v2312_v55  ;;  %v2371_v5 = vadd.f32 %v2369_v62, %v2317_v52 }
 0xbd2   : > { %3203 = vmatprep.mubr.msk.f32.mxu1 %vm2238_vm5, %v2370_v3 }
 0xbd3   : > { %3204 = vmatmul.mubr.msk.f32.vlgmr.msra.gmra.mrb[22].mxu1 %vm2238_vm5, %v2371_v5 }
 0xbd4   : > { %3728 = vmatpush3.bf16.msra.mxu1 %v3725_v21 }
 0xca6   : > { %v3205_v15 = vpop.f32.mrb[22].mxu1 }
 0xca7   : > { %v2456_v58 = vadd.f32 %v3205_v15, %v2377_v32  ;;  %v2450_v22 = vpop.f32.mrb[23].mxu1 }
 0xca8   : > { %v2451_v4 = vadd.f32 %v2450_v22, %v2377_v32 }
 0xcaa   : > { %3924 = vtanh.f32 %v2451_v4 }
 0xcab   : > { %3926 = vtanh.f32 %v2456_v58 }
 0xcb4   : > { %v3925_v23 = vpop.eup %3924 }
 0xcb5   : > { %v3927_v59 = vpop.eup %3926  ;;  %3210 = vmatprep.mubr.msk.f32.mxu1 %vm2238_vm5, %v3925_v23 }
 0xcb6   : > { %3211 = vmatmul.mubr.msk.f32.vlgmr.msra.gmra.mrb[24].mxu1 %vm2238_vm5, %v3927_v59 }
 0xd89   : > { %v3212_v35 = vpop.f32.mrb[24].mxu1 }
 0xd8a   : > { %v2545_v28 = vadd.f32 %v3212_v35, %v2466_v31  ;;  %v2539_v48 = vpop.f32.mrb[25].mxu1 }
 0xd8b   : > { %v2540_v6 = vadd.f32 %v2539_v48, %v2466_v31 }
 0xd8c   : > { %2549 = vst [vmem:[%s199_s15 + $0x8] sm:$0xff] %v2545_v28 }
 0xd8d   : > { %2548 = vst [vmem:[%s199_s15] sm:$0xff] %v2540_v6 }
 0xd8e PF: > { %s14_s12 = sadd.s32 1, %s3967_s12  }
 0xd8f   : > { %p11_p3 = scmp.ge.s32.totalorder %s14_s12, 6  }
 0xd91   :  { %13 = sbr.rel (!%p11_p3) target bundleno = 1 (0x1), region = 70 }
 0xd98   :  { %2571 = vsyncpa [#allocation4], 1 }
 0xd99   :  { %2573 = vsyncpa [#allocation4 + $0x1], 1 }

</bundles_post_ra>
